<compile_context>
chip_gen: v7x
topology: tpu7x:2x2x1
jax: 0.10.0
libtpu: 0.0.40
codegen_flags: <defaults>
</compile_context>

<pallas_src>
import functools

import jax
import jax.numpy as jnp
from jax import lax
from jax.experimental import pallas as pl
from jax.experimental.pallas import tpu as pltpu


# ----------------------------------------------------------------------------
# K1: row-tiled fused linear (+ bias, optional ReLU)
# ----------------------------------------------------------------------------
def _round_up(x, m):
    return ((x + m - 1) // m) * m


def _linear_kernel(x_ref, w_ref, b_ref, o_ref, *, apply_relu):
    acc = jnp.dot(x_ref[...], w_ref[...], preferred_element_type=jnp.float32)
    acc = acc + b_ref[...]
    if apply_relu:
        acc = jnp.maximum(acc, 0.0)
    o_ref[...] = acc.astype(o_ref.dtype)


def pallas_linear(x2d, w_t, b, *, apply_relu, tm=256):
    """y = x2d @ w_t + b (optionally ReLU), row-tiled over M with padding."""
    M, K = x2d.shape
    N = w_t.shape[1]
    tm_eff = min(tm, _round_up(M, 8))          # big row tile, multiple of 8 (f32)
    num_tiles = pl.cdiv(M, tm_eff)
    Mp = num_tiles * tm_eff
    if Mp != M:                                # pad M instead of asserting M % tm == 0
        x2d = jnp.pad(x2d, ((0, Mp - M), (0, 0)))

    out = pl.pallas_call(
        functools.partial(_linear_kernel, apply_relu=apply_relu),
        out_shape=jax.ShapeDtypeStruct((Mp, N), x2d.dtype),
        grid_spec=pltpu.PrefetchScalarGridSpec(
            num_scalar_prefetch=0,
            grid=(num_tiles,),
            in_specs=[
                pl.BlockSpec((tm_eff, K), lambda i: (i, 0)),   # row tile
                pl.BlockSpec((K, N), lambda i: (0, 0)),        # resident weight
                pl.BlockSpec((1, N), lambda i: (0, 0)),        # resident bias
            ],
            out_specs=pl.BlockSpec((tm_eff, N), lambda i: (i, 0)),
        ),
        compiler_params=pltpu.CompilerParams(
            dimension_semantics=("parallel",),
            vmem_limit_bytes=64 * 1024 * 1024,
        ),
    )(x2d, w_t, b.reshape(1, N))
    return out[:M]


# ----------------------------------------------------------------------------
# K2: bidirectional GRU recurrence, both directions fused into one pass
# ----------------------------------------------------------------------------
def _bigru_kernel(xr_ref, xz_ref, xn_ref, whh_ref, bhh_ref, out_ref):
    """PyTorch GRU equations; x-projections (x @ W_ih.T + b_ih) precomputed.

    Lanes of the hidden dimension H = 2*Hh are packed [fwd Hh | bwd Hh]; the
    backward direction's inputs were time-flipped in the wrapper so both
    directions advance the same local time index t.

    xr/xz/xn_ref : (T, B, H)   per-gate input projections (time-major)
    whh_ref      : (3, H, H)   block-diagonal hidden weights per gate (r, z, n)
    bhh_ref      : (3, 1, H)   hidden biases per gate
    out_ref      : (T, B, H)   hidden states h_t (bwd half in local time)
    """
    seq_len, bsz, hdim = out_ref.shape
    # Hoist loop-invariant weight/bias loads out of the recurrence.
    w_r, w_z, w_n = whh_ref[0], whh_ref[1], whh_ref[2]
    b_r, b_z, b_n = bhh_ref[0], bhh_ref[1], bhh_ref[2]

    def step(t, h):
        # Three gate matmuls depend only on h -> they pipeline back-to-back
        # through the MXU inside the loop-carried dependency.
        hr = jnp.dot(h, w_r, preferred_element_type=jnp.float32) + b_r
        hz = jnp.dot(h, w_z, preferred_element_type=jnp.float32) + b_z
        hn = jnp.dot(h, w_n, preferred_element_type=jnp.float32) + b_n
        r = jax.nn.sigmoid(xr_ref[t] + hr)
        z = jax.nn.sigmoid(xz_ref[t] + hz)
        n = jnp.tanh(xn_ref[t] + r * hn)
        h_new = (1.0 - z) * n + z * h
        out_ref[t] = h_new.astype(out_ref.dtype)
        return h_new

    lax.fori_loop(0, seq_len, step, jnp.zeros((bsz, hdim), jnp.float32))


# ----------------------------------------------------------------------------
# K3: fused trilinear self-attention + masked softmax + upsampler + residual
# ----------------------------------------------------------------------------
def _selfatt_kernel(mrow_ref, mcol_ref, enc_ref, res_ref, xw_ref, yw_ref,
                    dw_ref, wup_ref, bup_ref, o_ref):
    """One batch element.

    mrow_ref: (1, T)  c_mask row form        mcol_ref: (T, 1) c_mask column form
    enc_ref : (T, H)  BiGRU output           res_ref : (T, 4H) residual (original att)
    xw/yw/dw: (1, H)  trilinear weights      wup_ref : (3, H, 4H) upsampler W.T split
    bup_ref : (1, 4H) upsampler bias         o_ref   : (T, 4H)
    """
    seq = enc_ref.shape[0]
    enc = enc_ref[...].astype(jnp.float32)                        # (T, H)

    # --- TriLinearAttention(enc, enc) -------------------------------------
    s = jnp.einsum('ik,jk->ij', enc * dw_ref[...], enc,
                   preferred_element_type=jnp.float32)            # dot term (T, T)
    x_col = jnp.sum(enc * xw_ref[...], axis=1, keepdims=True)     # (T, 1)
    y_row = jnp.einsum('ik,jk->ij', yw_ref[...], enc,
                       preferred_element_type=jnp.float32)        # (1, T)
    s = s + x_col + y_row

    # --- pair mask = outer(c_mask, c_mask) * (1 - I), built in-kernel ------
    rid = lax.broadcasted_iota(jnp.int32, (seq, seq), 0)
    cid = lax.broadcasted_iota(jnp.int32, (seq, seq), 1)
    not_diag = (rid != cid).astype(jnp.float32)
    pmask = mcol_ref[...] * mrow_ref[...] * not_diag              # (T, T)

    # --- masked softmax: mask*logits + (1-mask)*(-1e30), then softmax ------
    logits = pmask * s + (1.0 - pmask) * (-1e30)
    logits = logits - jnp.max(logits, axis=-1, keepdims=True)
    probs = jnp.exp(logits)
    probs = probs / jnp.sum(probs, axis=-1, keepdims=True)

    # --- attended vector + upsampler Linear(3H->4H) + ReLU + residual ------
    sav = jnp.dot(probs, enc, preferred_element_type=jnp.float32)  # (T, H)
    # concat([sav, enc, enc*sav]) @ W_up.T decomposed into three dots
    # (algebraically identical, avoids a sub-128-lane concat relayout).
    up = (jnp.dot(sav, wup_ref[0], preferred_element_type=jnp.float32)
          + jnp.dot(enc, wup_ref[1], preferred_element_type=jnp.float32)
          + jnp.dot(enc * sav, wup_ref[2], preferred_element_type=jnp.float32)
          + bup_ref[...])
    out = res_ref[...].astype(jnp.float32) + jnp.maximum(up, 0.0)
    o_ref[...] = out.astype(o_ref.dtype)                          # lane-dense 4H store


# ----------------------------------------------------------------------------
# Forward wrapper
# ----------------------------------------------------------------------------
def self_att_forward(att, c_mask, p):
    """att: (B, T, 4H) float32, c_mask: (B, T) bool, p: parameter dict."""
    B, T, H4 = att.shape
    H = H4 // 4
    Hh = H // 2

    # ---- 1) att_wrapper: TimeDistributed(Linear(4H -> H)) + ReLU ----------
    a = pallas_linear(att.reshape(B * T, H4), p['w_att_t'], p['b_att'],
                      apply_relu=True)                            # (B*T, H)
    # TODO(synk): F.dropout(drop_prob) omitted -- inference / eval mode.

    # ---- 2) bidirectional GRU ---------------------------------------------
    # Input projections x @ W_ih.T + b_ih for BOTH directions fused into one
    # lane-dense matmul, then rearranged to per-gate (T, B, H) with lanes
    # packed [fwd Hh | bwd Hh]; backward direction time-flipped to local time.
    xp = pallas_linear(a, p['w_ih_t'], p['b_ih'], apply_relu=False)  # (B*T, 6*Hh)
    xp = xp.reshape(B, T, 2, 3, Hh)
    xp_f = xp[:, :, 0]                                               # (B, T, 3, Hh)
    xp_b = jnp.flip(xp[:, :, 1], axis=1)                             # bwd in local time
    xg = jnp.concatenate([xp_f, xp_b], axis=-1)                      # (B, T, 3, H)
    xg = jnp.transpose(xg, (2, 1, 0, 3))                             # (3, T, B, H)
    xr, xz, xn = xg[0], xg[1], xg[2]                                 # (T, B, H) each

    # Block-diagonal per-gate hidden weights: h=[h_f|h_b] -> [h_f@Wf | h_b@Wb].
    wf, wb = p['w_hh3'][0], p['w_hh3'][1]                            # (3, Hh, Hh)
    z3 = jnp.zeros_like(wf)
    w_bd = jnp.concatenate(
        [jnp.concatenate([wf, z3], axis=2),
         jnp.concatenate([z3, wb], axis=2)], axis=1)                 # (3, H, H)
    b_bd = jnp.concatenate([p['b_hh3'][0], p['b_hh3'][1]], axis=-1)  # (3, 1, H)

    gru_out = pl.pallas_call(
        _bigru_kernel,
        out_shape=jax.ShapeDtypeStruct((T, B, H), att.dtype),
        grid_spec=pltpu.PrefetchScalarGridSpec(
            num_scalar_prefetch=0,
            grid=(1,),
            in_specs=[
                pl.BlockSpec((T, B, H), lambda i: (0, 0, 0)),
                pl.BlockSpec((T, B, H), lambda i: (0, 0, 0)),
                pl.BlockSpec((T, B, H), lambda i: (0, 0, 0)),
                pl.BlockSpec((3, H, H), lambda i: (0, 0, 0)),
                pl.BlockSpec((3, 1, H), lambda i: (0, 0, 0)),
            ],
            out_specs=pl.BlockSpec((T, B, H), lambda i: (0, 0, 0)),
        ),
        compiler_params=pltpu.CompilerParams(
            dimension_semantics=("arbitrary",)),
    )(xr, xz, xn, w_bd, b_bd)                                        # (T, B, H)

    enc_f = gru_out[:, :, :Hh]                                       # (T, B, Hh)
    enc_b = jnp.flip(gru_out[:, :, Hh:], axis=0)                     # back to orig time
    encoder = jnp.transpose(jnp.concatenate([enc_f, enc_b], axis=-1),
                            (1, 0, 2))                               # (B, T, H)

    # ---- 3) fused trilinear self-attention block --------------------------
    cm = c_mask.astype(att.dtype)
    mask_row = cm.reshape(B, 1, T)
    mask_col = cm.reshape(B, T, 1)

    out = pl.pallas_call(
        _selfatt_kernel,
        out_shape=jax.ShapeDtypeStruct((B, T, H4), att.dtype),
        grid_spec=pltpu.PrefetchScalarGridSpec(
            num_scalar_prefetch=0,
            grid=(B,),
            in_specs=[
                pl.BlockSpec((None, 1, T), lambda b: (b, 0, 0)),     # mask row
                pl.BlockSpec((None, T, 1), lambda b: (b, 0, 0)),     # mask col
                pl.BlockSpec((None, T, H), lambda b: (b, 0, 0)),     # encoder
                pl.BlockSpec((None, T, H4), lambda b: (b, 0, 0)),    # residual att
                pl.BlockSpec((1, H), lambda b: (0, 0)),              # x weights
                pl.BlockSpec((1, H), lambda b: (0, 0)),              # y weights
                pl.BlockSpec((1, H), lambda b: (0, 0)),              # dot weights
                pl.BlockSpec((3, H, H4), lambda b: (0, 0, 0)),       # upsampler W
                pl.BlockSpec((1, H4), lambda b: (0, 0)),             # upsampler b
            ],
            out_specs=pl.BlockSpec((None, T, H4), lambda b: (b, 0, 0)),
        ),
        compiler_params=pltpu.CompilerParams(
            dimension_semantics=("parallel",)),
    )(mask_row, mask_col, encoder, att,
      p['xw_row'], p['yw_row'], p['dw_row'],
      p['w_up3'], p['b_up'].reshape(1, H4))
    # TODO(synk): final F.dropout(drop_prob) omitted -- inference / eval mode.
    return out


# ----------------------------------------------------------------------------
# Pure-JAX reference (mirrors the PyTorch forward, eval mode)
# ----------------------------------------------------------------------------
def self_att_reference(att, c_mask, p):
    B, T, H4 = att.shape
    H = H4 // 4
    Hh = H // 2
    hp = lax.Precision.HIGHEST

    a = jax.nn.relu(jnp.einsum('btk,kh->bth', att, p['w_att_t'], precision=hp)
                    + p['b_att'])
    xp = jnp.einsum('bth,hg->btg', a, p['w_ih_t'], precision=hp) + p['b_ih']
    xp = xp.reshape(B, T, 2, 3, Hh)

    def run_dir(d, reverse):
        xs = xp[:, :, d]                                   # (B, T, 3, Hh)
        if reverse:
            xs = jnp.flip(xs, axis=1)

        def step(h, x_t):                                  # x_t: (B, 3, Hh)
            hr = jnp.einsum('bh,hk->bk', h, p['w_hh3'][d, 0], precision=hp) + p['b_hh3'][d, 0]
            hz = jnp.einsum('bh,hk->bk', h, p['w_hh3'][d, 1], precision=hp) + p['b_hh3'][d, 1]
            hn = jnp.einsum('bh,hk->bk', h, p['w_hh3'][d, 2], precision=hp) + p['b_hh3'][d, 2]
            r = jax.nn.sigmoid(x_t[:, 0] + hr)
            z = jax.nn.sigmoid(x_t[:, 1] + hz)
            n = jnp.tanh(x_t[:, 2] + r * hn)
            h_new = (1.0 - z) * n + z * h
            return h_new, h_new

        h0 = jnp.zeros((B, Hh), att.dtype)
        _, hs = lax.scan(step, h0, jnp.swapaxes(xs, 0, 1))
        hs = jnp.swapaxes(hs, 0, 1)                        # (B, T, Hh)
        if reverse:
            hs = jnp.flip(hs, axis=1)
        return hs

    enc = jnp.concatenate([run_dir(0, False), run_dir(1, True)], axis=-1)  # (B,T,H)

    x_f = jnp.sum(enc * p['xw_row'], axis=-1, keepdims=True)
    y_f = jnp.sum(enc * p['yw_row'], axis=-1, keepdims=True)
    dot_f = jnp.einsum('bik,bjk->bij', enc * p['dw_row'], enc, precision=hp)
    s = dot_f + x_f + jnp.swapaxes(y_f, 1, 2)

    cm = c_mask.astype(att.dtype)
    pair = cm[:, :, None] * cm[:, None, :] * (1.0 - jnp.eye(T, dtype=att.dtype))[None]
    logits = pair * s + (1.0 - pair) * (-1e30)
    probs = jax.nn.softmax(logits, axis=-1)
    sav = jnp.einsum('bij,bjd->bid', probs, enc, precision=hp)

    up = (jnp.einsum('bid,dk->bik', sav, p['w_up3'][0], precision=hp)
          + jnp.einsum('bid,dk->bik', enc, p['w_up3'][1], precision=hp)
          + jnp.einsum('bid,dk->bik', enc * sav, p['w_up3'][2], precision=hp)
          + p['b_up'])
    return att + jax.nn.relu(up)


if __name__ == "__main__":
    batch, seq, hidden = 2, 8, 32
    h4, hh = 4 * hidden, hidden // 2

    key = jax.random.PRNGKey(0)
    ks = jax.random.split(key, 12)

    att = jax.random.normal(ks[0], (batch, seq, h4), dtype=jnp.float32)
    lengths = jnp.array([seq, seq - 3], dtype=jnp.int32)
    c_mask = jnp.arange(seq)[None, :] < lengths[:, None]          # (B, T) bool

    def uinit(k, shape, fan_in):
        bound = 1.0 / (fan_in ** 0.5)
        return jax.random.uniform(k, shape, jnp.float32, -bound, bound)

    std_tri = (6.0 / (hidden * 3 + 1)) ** 0.5
    params = {
        # att_wrapper: Linear(4H -> H), stored transposed (y = x @ W_t + b).
        'w_att_t': uinit(ks[1], (h4, hidden), h4),
        'b_att':   uinit(ks[2], (hidden,), h4),
        # GRU input projections, both directions fused: [fwd r,z,n | bwd r,z,n].
        'w_ih_t':  uinit(ks[3], (hidden, 2 * 3 * hh), hidden),
        'b_ih':    uinit(ks[4], (2 * 3 * hh,), hidden),
        # GRU hidden projections (dir, gate, Hh, Hh), transposed per gate.
        'w_hh3':   uinit(ks[5], (2, 3, hh, hh), hh),
        'b_hh3':   uinit(ks[6], (2, 3, 1, hh), hh),
        # TriLinearAttention weights (x/y weight vectors stored as row vectors).
        'xw_row':  jax.random.uniform(ks[7], (1, hidden), jnp.float32, -std_tri, std_tri),
        'yw_row':  jax.random.uniform(ks[8], (1, hidden), jnp.float32, -std_tri, std_tri),
        'dw_row':  jax.random.uniform(ks[9], (1, hidden), jnp.float32, -std_tri, std_tri),
        # self_att_upsampler: Linear(3H -> 4H); W.T reshaped to (3, H, 4H) so
        # concat([v, enc, enc*v]) @ W.T splits into three dots.
        'w_up3':   uinit(ks[10], (3, hidden, h4), 3 * hidden),
        'b_up':    uinit(ks[11], (h4,), 3 * hidden),
    }

    out = jax.jit(self_att_forward)(att, c_mask, params)
    out = jax.block_until_ready(out)

    ref = self_att_reference(att, c_mask, params)
    assert out.shape == (batch, seq, h4), out.shape
    max_err = float(jnp.max(jnp.abs(out - ref)))
    # MXU f32 matmuls may use multi-pass bf16 internally -> small slack.
    assert max_err < 1e-2, f"mismatch vs reference, max abs err = {max_err}"
    print("KERNEL_OK")
</pallas_src>

<mosaic_0001>
module attributes {stable_mosaic.version = 11 : i64} {
  func.func @_linear_kernel(%arg0: i32, %arg1: memref<16x32xf32, #tpu.memory_space<vmem>>, %arg2: memref<32x96xf32, #tpu.memory_space<vmem>>, %arg3: memref<1x96xf32, #tpu.memory_space<vmem>>, %arg4: memref<16x96xf32, #tpu.memory_space<vmem>>) attributes {dimension_semantics = [#tpu.dimension_semantics<parallel>], iteration_bounds = array<i64: 1>, scalar_prefetch = 0 : i64, scratch_operands = 0 : i64, tpu.core_type = #tpu.core_type<tc>, window_params = [{transform_indices = @transform_0, window_bounds = array<i64: 16, 32>}, {pipeline_mode = #tpu.pipeline_mode<synchronous>, transform_indices = @transform_1, window_bounds = array<i64: 32, 96>}, {pipeline_mode = #tpu.pipeline_mode<synchronous>, transform_indices = @transform_2, window_bounds = array<i64: 1, 96>}, {transform_indices = @transform_3, window_bounds = array<i64: 16, 96>}]} {
    %c0 = arith.constant 0 : index
    %c0_0 = arith.constant 0 : index
    %0 = vector.load %arg1[%c0, %c0_0] : memref<16x32xf32, #tpu.memory_space<vmem>>, vector<16x32xf32>
    %c0_1 = arith.constant 0 : index
    %c0_2 = arith.constant 0 : index
    %1 = vector.load %arg2[%c0_1, %c0_2] : memref<32x96xf32, #tpu.memory_space<vmem>>, vector<32x96xf32>
    %cst = arith.constant dense<0.000000e+00> : vector<16x96xf32>
    %2 = tpu.matmul %0, %1, %cst {dimension_numbers = #tpu.dot_dimension_numbers<[1], [0], [0], [1], [0, 0, 1, 1], [], []>} : vector<16x32xf32>, vector<32x96xf32>, vector<16x96xf32> -> vector<16x96xf32>
    %c0_3 = arith.constant 0 : index
    %c0_4 = arith.constant 0 : index
    %3 = vector.load %arg3[%c0_3, %c0_4] : memref<1x96xf32, #tpu.memory_space<vmem>>, vector<1x96xf32>
    %4 = vector.broadcast %3 : vector<1x96xf32> to vector<16x96xf32>
    %5 = arith.addf %2, %4 : vector<16x96xf32>
    %c0_5 = arith.constant 0 : index
    %c0_6 = arith.constant 0 : index
    %6 = vector.load %arg4[%c0_5, %c0_6] : memref<16x96xf32, #tpu.memory_space<vmem>>, vector<16x96xf32>
    tpu.vector_store %arg4[%c0_5, %c0_6], %5 {strides = array<i32>} : memref<16x96xf32, #tpu.memory_space<vmem>>, vector<16x96xf32>,
    return
  }
  func.func @transform_0(%arg0: i32) -> (i32, i32) {
    %c0_i32 = arith.constant 0 : i32
    %c0_i32_0 = arith.constant 0 : i32
    return %arg0, %c0_i32 : i32, i32
  }
  func.func @transform_1(%arg0: i32) -> (i32, i32) {
    %c0_i32 = arith.constant 0 : i32
    %c0_i32_0 = arith.constant 0 : i32
    %c0_i32_1 = arith.constant 0 : i32
    return %c0_i32, %c0_i32_0 : i32, i32
  }
  func.func @transform_2(%arg0: i32) -> (i32, i32) {
    %c0_i32 = arith.constant 0 : i32
    %c0_i32_0 = arith.constant 0 : i32
    %c0_i32_1 = arith.constant 0 : i32
    return %c0_i32, %c0_i32_0 : i32, i32
  }
  func.func @transform_3(%arg0: i32) -> (i32, i32) {
    %c0_i32 = arith.constant 0 : i32
    %c0_i32_0 = arith.constant 0 : i32
    return %arg0, %c0_i32 : i32, i32
  }
}

module attributes {stable_mosaic.version = 11 : i64} {
  func.func @_linear_kernel(%arg0: i32, %arg1: memref<16x128xf32, #tpu.memory_space<vmem>>, %arg2: memref<128x32xf32, #tpu.memory_space<vmem>>, %arg3: memref<1x32xf32, #tpu.memory_space<vmem>>, %arg4: memref<16x32xf32, #tpu.memory_space<vmem>>) attributes {dimension_semantics = [#tpu.dimension_semantics<parallel>], iteration_bounds = array<i64: 1>, scalar_prefetch = 0 : i64, scratch_operands = 0 : i64, tpu.core_type = #tpu.core_type<tc>, window_params = [{transform_indices = @transform_0, window_bounds = array<i64: 16, 128>}, {pipeline_mode = #tpu.pipeline_mode<synchronous>, transform_indices = @transform_1, window_bounds = array<i64: 128, 32>}, {pipeline_mode = #tpu.pipeline_mode<synchronous>, transform_indices = @transform_2, window_bounds = array<i64: 1, 32>}, {transform_indices = @transform_3, window_bounds = array<i64: 16, 32>}]} {
    %c0 = arith.constant 0 : index
    %c0_0 = arith.constant 0 : index
    %0 = vector.load %arg1[%c0, %c0_0] : memref<16x128xf32, #tpu.memory_space<vmem>>, vector<16x128xf32>
    %c0_1 = arith.constant 0 : index
    %c0_2 = arith.constant 0 : index
    %1 = vector.load %arg2[%c0_1, %c0_2] : memref<128x32xf32, #tpu.memory_space<vmem>>, vector<128x32xf32>
    %cst = arith.constant dense<0.000000e+00> : vector<16x32xf32>
    %2 = tpu.matmul %0, %1, %cst {dimension_numbers = #tpu.dot_dimension_numbers<[1], [0], [0], [1], [0, 0, 1, 1], [], []>} : vector<16x128xf32>, vector<128x32xf32>, vector<16x32xf32> -> vector<16x32xf32>
    %c0_3 = arith.constant 0 : index
    %c0_4 = arith.constant 0 : index
    %3 = vector.load %arg3[%c0_3, %c0_4] : memref<1x32xf32, #tpu.memory_space<vmem>>, vector<1x32xf32>
    %4 = vector.broadcast %3 : vector<1x32xf32> to vector<16x32xf32>
    %5 = arith.addf %2, %4 : vector<16x32xf32>
    %cst_5 = arith.constant 0.000000e+00 : f32
    %6 = vector.broadcast %cst_5 : f32 to vector<16x32xf32>
    %7 = arith.maximumf %5, %6 : vector<16x32xf32>
    %c0_6 = arith.constant 0 : index
    %c0_7 = arith.constant 0 : index
    %8 = vector.load %arg4[%c0_6, %c0_7] : memref<16x32xf32, #tpu.memory_space<vmem>>, vector<16x32xf32>
    tpu.vector_store %arg4[%c0_6, %c0_7], %7 {strides = array<i32>} : memref<16x32xf32, #tpu.memory_space<vmem>>, vector<16x32xf32>,
    return
  }
  func.func @transform_0(%arg0: i32) -> (i32, i32) {
    %c0_i32 = arith.constant 0 : i32
    %c0_i32_0 = arith.constant 0 : i32
    return %arg0, %c0_i32 : i32, i32
  }
  func.func @transform_1(%arg0: i32) -> (i32, i32) {
    %c0_i32 = arith.constant 0 : i32
    %c0_i32_0 = arith.constant 0 : i32
    %c0_i32_1 = arith.constant 0 : i32
    return %c0_i32, %c0_i32_0 : i32, i32
  }
  func.func @transform_2(%arg0: i32) -> (i32, i32) {
    %c0_i32 = arith.constant 0 : i32
    %c0_i32_0 = arith.constant 0 : i32
    %c0_i32_1 = arith.constant 0 : i32
    return %c0_i32, %c0_i32_0 : i32, i32
  }
  func.func @transform_3(%arg0: i32) -> (i32, i32) {
    %c0_i32 = arith.constant 0 : i32
    %c0_i32_0 = arith.constant 0 : i32
    return %arg0, %c0_i32 : i32, i32
  }
}

module attributes {stable_mosaic.version = 11 : i64} {
  func.func @_bigru_kernel(%arg0: i32, %arg1: memref<8x2x32xf32, #tpu.memory_space<vmem>>, %arg2: memref<8x2x32xf32, #tpu.memory_space<vmem>>, %arg3: memref<8x2x32xf32, #tpu.memory_space<vmem>>, %arg4: memref<3x32x32xf32, #tpu.memory_space<vmem>>, %arg5: memref<3x1x32xf32, #tpu.memory_space<vmem>>, %arg6: memref<8x2x32xf32, #tpu.memory_space<vmem>>) attributes {dimension_semantics = [#tpu.dimension_semantics<arbitrary>], iteration_bounds = array<i64: 1>, scalar_prefetch = 0 : i64, scratch_operands = 0 : i64, tpu.core_type = #tpu.core_type<tc>, window_params = [{pipeline_mode = #tpu.pipeline_mode<synchronous>, transform_indices = @transform_0, window_bounds = array<i64: 8, 2, 32>}, {pipeline_mode = #tpu.pipeline_mode<synchronous>, transform_indices = @transform_1, window_bounds = array<i64: 8, 2, 32>}, {pipeline_mode = #tpu.pipeline_mode<synchronous>, transform_indices = @transform_2, window_bounds = array<i64: 8, 2, 32>}, {pipeline_mode = #tpu.pipeline_mode<synchronous>, transform_indices = @transform_3, window_bounds = array<i64: 3, 32, 32>}, {pipeline_mode = #tpu.pipeline_mode<synchronous>, transform_indices = @transform_4, window_bounds = array<i64: 3, 1, 32>}, {pipeline_mode = #tpu.pipeline_mode<synchronous>, transform_indices = @transform_5, window_bounds = array<i64: 8, 2, 32>}]} {
    %c0 = arith.constant 0 : index
    %c0_0 = arith.constant 0 : index
    %c0_1 = arith.constant 0 : index
    %0 = vector.load %arg4[%c0, %c0_0, %c0_1] : memref<3x32x32xf32, #tpu.memory_space<vmem>>, vector<1x32x32xf32>
    %1 = vector.shape_cast %0 : vector<1x32x32xf32> to vector<32x32xf32>
    %c1 = arith.constant 1 : index
    %c0_2 = arith.constant 0 : index
    %c0_3 = arith.constant 0 : index
    %2 = vector.load %arg4[%c1, %c0_2, %c0_3] : memref<3x32x32xf32, #tpu.memory_space<vmem>>, vector<1x32x32xf32>
    %3 = vector.shape_cast %2 : vector<1x32x32xf32> to vector<32x32xf32>
    %c2 = arith.constant 2 : index
    %c0_4 = arith.constant 0 : index
    %c0_5 = arith.constant 0 : index
    %4 = vector.load %arg4[%c2, %c0_4, %c0_5] : memref<3x32x32xf32, #tpu.memory_space<vmem>>, vector<1x32x32xf32>
    %5 = vector.shape_cast %4 : vector<1x32x32xf32> to vector<32x32xf32>
    %c0_6 = arith.constant 0 : index
    %c0_7 = arith.constant 0 : index
    %c0_8 = arith.constant 0 : index
    %6 = vector.load %arg5[%c0_6, %c0_7, %c0_8] : memref<3x1x32xf32, #tpu.memory_space<vmem>>, vector<1x1x32xf32>
    %7 = vector.shape_cast %6 : vector<1x1x32xf32> to vector<1x32xf32>
    %c1_9 = arith.constant 1 : index
    %c0_10 = arith.constant 0 : index
    %c0_11 = arith.constant 0 : index
    %8 = vector.load %arg5[%c1_9, %c0_10, %c0_11] : memref<3x1x32xf32, #tpu.memory_space<vmem>>, vector<1x1x32xf32>
    %9 = vector.shape_cast %8 : vector<1x1x32xf32> to vector<1x32xf32>
    %c2_12 = arith.constant 2 : index
    %c0_13 = arith.constant 0 : index
    %c0_14 = arith.constant 0 : index
    %10 = vector.load %arg5[%c2_12, %c0_13, %c0_14] : memref<3x1x32xf32, #tpu.memory_space<vmem>>, vector<1x1x32xf32>
    %11 = vector.shape_cast %10 : vector<1x1x32xf32> to vector<1x32xf32>
    %cst = arith.constant 0.000000e+00 : f32
    %12 = vector.broadcast %cst : f32 to vector<2x32xf32>
    %c0_i32 = arith.constant 0 : i32
    %c8_i32 = arith.constant 8 : i32
    %13 = arith.addi %c0_i32, %c8_i32 : i32
    %c1_i32 = arith.constant 1 : i32
    %14 = scf.for %arg7 = %c0_i32 to %13 step %c1_i32 iter_args(%arg8 = %12) -> (vector<2x32xf32>)  : i32 {
      %cst_16 = arith.constant dense<0.000000e+00> : vector<2x32xf32>
      %15 = tpu.matmul %arg8, %1, %cst_16 {dimension_numbers = #tpu.dot_dimension_numbers<[1], [0], [0], [1], [0, 0, 1, 1], [], []>} : vector<2x32xf32>, vector<32x32xf32>, vector<2x32xf32> -> vector<2x32xf32>
      %16 = vector.broadcast %7 : vector<1x32xf32> to vector<2x32xf32>
      %17 = arith.addf %15, %16 : vector<2x32xf32>
      %cst_17 = arith.constant dense<0.000000e+00> : vector<2x32xf32>
      %18 = tpu.matmul %arg8, %3, %cst_17 {dimension_numbers = #tpu.dot_dimension_numbers<[1], [0], [0], [1], [0, 0, 1, 1], [], []>} : vector<2x32xf32>, vector<32x32xf32>, vector<2x32xf32> -> vector<2x32xf32>
      %19 = vector.broadcast %9 : vector<1x32xf32> to vector<2x32xf32>
      %20 = arith.addf %18, %19 : vector<2x32xf32>
      %cst_18 = arith.constant dense<0.000000e+00> : vector<2x32xf32>
      %21 = tpu.matmul %arg8, %5, %cst_18 {dimension_numbers = #tpu.dot_dimension_numbers<[1], [0], [0], [1], [0, 0, 1, 1], [], []>} : vector<2x32xf32>, vector<32x32xf32>, vector<2x32xf32> -> vector<2x32xf32>
      %22 = vector.broadcast %11 : vector<1x32xf32> to vector<2x32xf32>
      %23 = arith.addf %21, %22 : vector<2x32xf32>
      %24 = arith.index_cast %arg7 : i32 to index
      %c0_19 = arith.constant 0 : index
      %c0_20 = arith.constant 0 : index
      %25 = vector.load %arg1[%24, %c0_19, %c0_20] : memref<8x2x32xf32, #tpu.memory_space<vmem>>, vector<1x2x32xf32>
      %26 = vector.shape_cast %25 : vector<1x2x32xf32> to vector<2x32xf32>
      %27 = arith.addf %26, %17 : vector<2x32xf32>
      %28 = arith.negf %27 : vector<2x32xf32>
      %29 = math.exp %28 : vector<2x32xf32>
      %cst_21 = arith.constant 1.000000e+00 : f32
      %30 = vector.broadcast %cst_21 : f32 to vector<2x32xf32>
      %31 = arith.addf %30, %29 : vector<2x32xf32>
      %32 = arith.divf %30, %31 : vector<2x32xf32>
      %33 = arith.index_cast %arg7 : i32 to index
      %c0_22 = arith.constant 0 : index
      %c0_23 = arith.constant 0 : index
      %34 = vector.load %arg2[%33, %c0_22, %c0_23] : memref<8x2x32xf32, #tpu.memory_space<vmem>>, vector<1x2x32xf32>
      %35 = vector.shape_cast %34 : vector<1x2x32xf32> to vector<2x32xf32>
      %36 = arith.addf %35, %20 : vector<2x32xf32>
      %37 = arith.negf %36 : vector<2x32xf32>
      %38 = math.exp %37 : vector<2x32xf32>
      %cst_24 = arith.constant 1.000000e+00 : f32
      %39 = vector.broadcast %cst_24 : f32 to vector<2x32xf32>
      %40 = arith.addf %39, %38 : vector<2x32xf32>
      %41 = arith.divf %39, %40 : vector<2x32xf32>
      %42 = arith.index_cast %arg7 : i32 to index
      %c0_25 = arith.constant 0 : index
      %c0_26 = arith.constant 0 : index
      %43 = vector.load %arg3[%42, %c0_25, %c0_26] : memref<8x2x32xf32, #tpu.memory_space<vmem>>, vector<1x2x32xf32>
      %44 = vector.shape_cast %43 : vector<1x2x32xf32> to vector<2x32xf32>
      %45 = arith.mulf %32, %23 : vector<2x32xf32>
      %46 = arith.addf %44, %45 : vector<2x32xf32>
      %47 = math.tanh %46 : vector<2x32xf32>
      %cst_27 = arith.constant 1.000000e+00 : f32
      %48 = vector.broadcast %cst_27 : f32 to vector<2x32xf32>
      %49 = arith.subf %48, %41 : vector<2x32xf32>
      %50 = arith.mulf %49, %47 : vector<2x32xf32>
      %51 = arith.mulf %41, %arg8 : vector<2x32xf32>
      %52 = arith.addf %50, %51 : vector<2x32xf32>
      %53 = arith.index_cast %arg7 : i32 to index
      %c0_28 = arith.constant 0 : index
      %c0_29 = arith.constant 0 : index
      %54 = vector.load %arg6[%53, %c0_28, %c0_29] : memref<8x2x32xf32, #tpu.memory_space<vmem>>, vector<1x2x32xf32>
      %55 = vector.shape_cast %54 : vector<1x2x32xf32> to vector<2x32xf32>
      %56 = vector.shape_cast %52 : vector<2x32xf32> to vector<1x2x32xf32>
      tpu.vector_store %arg6[%53, %c0_28, %c0_29], %56 {strides = array<i32>} : memref<8x2x32xf32, #tpu.memory_space<vmem>>, vector<1x2x32xf32>,
      scf.yield %52 : vector<2x32xf32>
    }
    %c8_i32_15 = arith.constant 8 : i32
    return
  }
  func.func @transform_0(%arg0: i32) -> (i32, i32, i32) {
    %c0_i32 = arith.constant 0 : i32
    %c0_i32_0 = arith.constant 0 : i32
    %c0_i32_1 = arith.constant 0 : i32
    %c0_i32_2 = arith.constant 0 : i32
    return %c0_i32, %c0_i32_0, %c0_i32_1 : i32, i32, i32
  }
  func.func @transform_1(%arg0: i32) -> (i32, i32, i32) {
    %c0_i32 = arith.constant 0 : i32
    %c0_i32_0 = arith.constant 0 : i32
    %c0_i32_1 = arith.constant 0 : i32
    %c0_i32_2 = arith.constant 0 : i32
    return %c0_i32, %c0_i32_0, %c0_i32_1 : i32, i32, i32
  }
  func.func @transform_2(%arg0: i32) -> (i32, i32, i32) {
    %c0_i32 = arith.constant 0 : i32
    %c0_i32_0 = arith.constant 0 : i32
    %c0_i32_1 = arith.constant 0 : i32
    %c0_i32_2 = arith.constant 0 : i32
    return %c0_i32, %c0_i32_0, %c0_i32_1 : i32, i32, i32
  }
  func.func @transform_3(%arg0: i32) -> (i32, i32, i32) {
    %c0_i32 = arith.constant 0 : i32
    %c0_i32_0 = arith.constant 0 : i32
    %c0_i32_1 = arith.constant 0 : i32
    %c0_i32_2 = arith.constant 0 : i32
    return %c0_i32, %c0_i32_0, %c0_i32_1 : i32, i32, i32
  }
  func.func @transform_4(%arg0: i32) -> (i32, i32, i32) {
    %c0_i32 = arith.constant 0 : i32
    %c0_i32_0 = arith.constant 0 : i32
    %c0_i32_1 = arith.constant 0 : i32
    %c0_i32_2 = arith.constant 0 : i32
    return %c0_i32, %c0_i32_0, %c0_i32_1 : i32, i32, i32
  }
  func.func @transform_5(%arg0: i32) -> (i32, i32, i32) {
    %c0_i32 = arith.constant 0 : i32
    %c0_i32_0 = arith.constant 0 : i32
    %c0_i32_1 = arith.constant 0 : i32
    %c0_i32_2 = arith.constant 0 : i32
    return %c0_i32, %c0_i32_0, %c0_i32_1 : i32, i32, i32
  }
}

module attributes {stable_mosaic.version = 11 : i64} {
  func.func @_selfatt_kernel(%arg0: i32, %arg1: memref<1x1x8xf32, #tpu.memory_space<vmem>>, %arg2: memref<1x8x1xf32, #tpu.memory_space<vmem>>, %arg3: memref<1x8x32xf32, #tpu.memory_space<vmem>>, %arg4: memref<1x8x128xf32, #tpu.memory_space<vmem>>, %arg5: memref<1x32xf32, #tpu.memory_space<vmem>>, %arg6: memref<1x32xf32, #tpu.memory_space<vmem>>, %arg7: memref<1x32xf32, #tpu.memory_space<vmem>>, %arg8: memref<3x32x128xf32, #tpu.memory_space<vmem>>, %arg9: memref<1x128xf32, #tpu.memory_space<vmem>>, %arg10: memref<1x8x128xf32, #tpu.memory_space<vmem>>) attributes {dimension_semantics = [#tpu.dimension_semantics<parallel>], iteration_bounds = array<i64: 2>, scalar_prefetch = 0 : i64, scratch_operands = 0 : i64, tpu.core_type = #tpu.core_type<tc>, window_params = [{transform_indices = @transform_0, window_bounds = array<i64: 1, 1, 8>}, {transform_indices = @transform_1, window_bounds = array<i64: 1, 8, 1>}, {transform_indices = @transform_2, window_bounds = array<i64: 1, 8, 32>}, {transform_indices = @transform_3, window_bounds = array<i64: 1, 8, 128>}, {pipeline_mode = #tpu.pipeline_mode<synchronous>, transform_indices = @transform_4, window_bounds = array<i64: 1, 32>}, {pipeline_mode = #tpu.pipeline_mode<synchronous>, transform_indices = @transform_5, window_bounds = array<i64: 1, 32>}, {pipeline_mode = #tpu.pipeline_mode<synchronous>, transform_indices = @transform_6, window_bounds = array<i64: 1, 32>}, {pipeline_mode = #tpu.pipeline_mode<synchronous>, transform_indices = @transform_7, window_bounds = array<i64: 3, 32, 128>}, {pipeline_mode = #tpu.pipeline_mode<synchronous>, transform_indices = @transform_8, window_bounds = array<i64: 1, 128>}, {transform_indices = @transform_9, window_bounds = array<i64: 1, 8, 128>}]} {
    %c0 = arith.constant 0 : index
    %c0_0 = arith.constant 0 : index
    %c0_1 = arith.constant 0 : index
    %0 = vector.load %arg3[%c0, %c0_0, %c0_1] : memref<1x8x32xf32, #tpu.memory_space<vmem>>, vector<1x8x32xf32>
    %1 = vector.shape_cast %0 : vector<1x8x32xf32> to vector<8x32xf32>
    %c0_2 = arith.constant 0 : index
    %c0_3 = arith.constant 0 : index
    %2 = vector.load %arg7[%c0_2, %c0_3] : memref<1x32xf32, #tpu.memory_space<vmem>>, vector<1x32xf32>
    %3 = vector.broadcast %2 : vector<1x32xf32> to vector<8x32xf32>
    %4 = arith.mulf %1, %3 : vector<8x32xf32>
    "tpu.trace_start"() <{level = 10 : i32, message = "ik,jk->ij"}> : () -> ()
    %cst = arith.constant dense<0.000000e+00> : vector<8x8xf32>
    %5 = tpu.matmul %4, %1, %cst {dimension_numbers = #tpu.dot_dimension_numbers<[1], [1], [0], [0], [0, 0, 1, 0], [], []>} : vector<8x32xf32>, vector<8x32xf32>, vector<8x8xf32> -> vector<8x8xf32>
    "tpu.trace_stop"() : () -> ()
    %c0_4 = arith.constant 0 : index
    %c0_5 = arith.constant 0 : index
    %6 = vector.load %arg5[%c0_4, %c0_5] : memref<1x32xf32, #tpu.memory_space<vmem>>, vector<1x32xf32>
    %7 = vector.broadcast %6 : vector<1x32xf32> to vector<8x32xf32>
    %8 = arith.mulf %1, %7 : vector<8x32xf32>
    %cst_6 = arith.constant dense<0.000000e+00> : vector<8xf32>
    %9 = vector.multi_reduction <add>, %8, %cst_6 [1] : vector<8x32xf32> to vector<8xf32>
    %10 = vector.shape_cast %9 : vector<8xf32> to vector<8x1xf32>
    %c0_7 = arith.constant 0 : index
    %c0_8 = arith.constant 0 : index
    %11 = vector.load %arg6[%c0_7, %c0_8] : memref<1x32xf32, #tpu.memory_space<vmem>>, vector<1x32xf32>
    "tpu.trace_start"() <{level = 10 : i32, message = "ik,jk->ij"}> : () -> ()
    %cst_9 = arith.constant dense<0.000000e+00> : vector<1x8xf32>
    %12 = tpu.matmul %11, %1, %cst_9 {dimension_numbers = #tpu.dot_dimension_numbers<[1], [1], [0], [0], [0, 0, 1, 0], [], []>} : vector<1x32xf32>, vector<8x32xf32>, vector<1x8xf32> -> vector<1x8xf32>
    "tpu.trace_stop"() : () -> ()
    %13 = vector.broadcast %10 : vector<8x1xf32> to vector<8x8xf32>
    %14 = arith.addf %5, %13 : vector<8x8xf32>
    %15 = vector.broadcast %12 : vector<1x8xf32> to vector<8x8xf32>
    %16 = arith.addf %14, %15 : vector<8x8xf32>
    %17 = tpu.iota {dimensions = array<i32: 0>} : vector<8x8xi32>
    %18 = tpu.iota {dimensions = array<i32: 1>} : vector<8x8xi32>
    %19 = arith.cmpi ne, %17, %18 : vector<8x8xi32>
    %20 = arith.extui %19 : vector<8x8xi1> to vector<8x8xi32>
    %21 = arith.sitofp %20 : vector<8x8xi32> to vector<8x8xf32>
    %c0_10 = arith.constant 0 : index
    %c0_11 = arith.constant 0 : index
    %c0_12 = arith.constant 0 : index
    %22 = vector.load %arg2[%c0_10, %c0_11, %c0_12] : memref<1x8x1xf32, #tpu.memory_space<vmem>>, vector<1x8x1xf32>
    %23 = vector.shape_cast %22 : vector<1x8x1xf32> to vector<8x1xf32>
    %c0_13 = arith.constant 0 : index
    %c0_14 = arith.constant 0 : index
    %c0_15 = arith.constant 0 : index
    %24 = vector.load %arg1[%c0_13, %c0_14, %c0_15] : memref<1x1x8xf32, #tpu.memory_space<vmem>>, vector<1x1x8xf32>
    %25 = vector.shape_cast %24 : vector<1x1x8xf32> to vector<1x8xf32>
    %26 = vector.broadcast %23 : vector<8x1xf32> to vector<8x8xf32>
    %27 = vector.broadcast %25 : vector<1x8xf32> to vector<8x8xf32>
    %28 = arith.mulf %26, %27 : vector<8x8xf32>
    %29 = arith.mulf %28, %21 : vector<8x8xf32>
    %30 = arith.mulf %29, %16 : vector<8x8xf32>
    %cst_16 = arith.constant 1.000000e+00 : f32
    %31 = vector.broadcast %cst_16 : f32 to vector<8x8xf32>
    %32 = arith.subf %31, %29 : vector<8x8xf32>
    %cst_17 = arith.constant -1.000000e+30 : f32
    %33 = vector.broadcast %cst_17 : f32 to vector<8x8xf32>
    %34 = arith.mulf %32, %33 : vector<8x8xf32>
    %35 = arith.addf %30, %34 : vector<8x8xf32>
    %cst_18 = arith.constant dense<0xFF800000> : vector<8xf32>
    %36 = vector.multi_reduction <maximumf>, %35, %cst_18 [1] : vector<8x8xf32> to vector<8xf32>
    %37 = vector.shape_cast %36 : vector<8xf32> to vector<8x1xf32>
    %38 = vector.broadcast %37 : vector<8x1xf32> to vector<8x8xf32>
    %39 = arith.subf %35, %38 : vector<8x8xf32>
    %40 = math.exp %39 : vector<8x8xf32>
    %cst_19 = arith.constant dense<0.000000e+00> : vector<8xf32>
    %41 = vector.multi_reduction <add>, %40, %cst_19 [1] : vector<8x8xf32> to vector<8xf32>
    %42 = vector.shape_cast %41 : vector<8xf32> to vector<8x1xf32>
    %43 = vector.broadcast %42 : vector<8x1xf32> to vector<8x8xf32>
    %44 = arith.divf %40, %43 : vector<8x8xf32>
    %cst_20 = arith.constant dense<0.000000e+00> : vector<8x32xf32>
    %45 = tpu.matmul %44, %1, %cst_20 {dimension_numbers = #tpu.dot_dimension_numbers<[1], [0], [0], [1], [0, 0, 1, 1], [], []>} : vector<8x8xf32>, vector<8x32xf32>, vector<8x32xf32> -> vector<8x32xf32>
    %c0_21 = arith.constant 0 : index
    %c0_22 = arith.constant 0 : index
    %c0_23 = arith.constant 0 : index
    %46 = vector.load %arg8[%c0_21, %c0_22, %c0_23] : memref<3x32x128xf32, #tpu.memory_space<vmem>>, vector<1x32x128xf32>
    %47 = vector.shape_cast %46 : vector<1x32x128xf32> to vector<32x128xf32>
    %cst_24 = arith.constant dense<0.000000e+00> : vector<8x128xf32>
    %48 = tpu.matmul %45, %47, %cst_24 {dimension_numbers = #tpu.dot_dimension_numbers<[1], [0], [0], [1], [0, 0, 1, 1], [], []>} : vector<8x32xf32>, vector<32x128xf32>, vector<8x128xf32> -> vector<8x128xf32>
    %c1 = arith.constant 1 : index
    %c0_25 = arith.constant 0 : index
    %c0_26 = arith.constant 0 : index
    %49 = vector.load %arg8[%c1, %c0_25, %c0_26] : memref<3x32x128xf32, #tpu.memory_space<vmem>>, vector<1x32x128xf32>
    %50 = vector.shape_cast %49 : vector<1x32x128xf32> to vector<32x128xf32>
    %cst_27 = arith.constant dense<0.000000e+00> : vector<8x128xf32>
    %51 = tpu.matmul %1, %50, %cst_27 {dimension_numbers = #tpu.dot_dimension_numbers<[1], [0], [0], [1], [0, 0, 1, 1], [], []>} : vector<8x32xf32>, vector<32x128xf32>, vector<8x128xf32> -> vector<8x128xf32>
    %52 = arith.addf %48, %51 : vector<8x128xf32>
    %53 = arith.mulf %1, %45 : vector<8x32xf32>
    %c2 = arith.constant 2 : index
    %c0_28 = arith.constant 0 : index
    %c0_29 = arith.constant 0 : index
    %54 = vector.load %arg8[%c2, %c0_28, %c0_29] : memref<3x32x128xf32, #tpu.memory_space<vmem>>, vector<1x32x128xf32>
    %55 = vector.shape_cast %54 : vector<1x32x128xf32> to vector<32x128xf32>
    %cst_30 = arith.constant dense<0.000000e+00> : vector<8x128xf32>
    %56 = tpu.matmul %53, %55, %cst_30 {dimension_numbers = #tpu.dot_dimension_numbers<[1], [0], [0], [1], [0, 0, 1, 1], [], []>} : vector<8x32xf32>, vector<32x128xf32>, vector<8x128xf32> -> vector<8x128xf32>
    %57 = arith.addf %52, %56 : vector<8x128xf32>
    %c0_31 = arith.constant 0 : index
    %c0_32 = arith.constant 0 : index
    %58 = vector.load %arg9[%c0_31, %c0_32] : memref<1x128xf32, #tpu.memory_space<vmem>>, vector<1x128xf32>
    %59 = vector.broadcast %58 : vector<1x128xf32> to vector<8x128xf32>
    %60 = arith.addf %57, %59 : vector<8x128xf32>
    %c0_33 = arith.constant 0 : index
    %c0_34 = arith.constant 0 : index
    %c0_35 = arith.constant 0 : index
    %61 = vector.load %arg4[%c0_33, %c0_34, %c0_35] : memref<1x8x128xf32, #tpu.memory_space<vmem>>, vector<1x8x128xf32>
    %62 = vector.shape_cast %61 : vector<1x8x128xf32> to vector<8x128xf32>
    %cst_36 = arith.constant 0.000000e+00 : f32
    %63 = vector.broadcast %cst_36 : f32 to vector<8x128xf32>
    %64 = arith.maximumf %60, %63 : vector<8x128xf32>
    %65 = arith.addf %62, %64 : vector<8x128xf32>
    %c0_37 = arith.constant 0 : index
    %c0_38 = arith.constant 0 : index
    %c0_39 = arith.constant 0 : index
    %66 = vector.load %arg10[%c0_37, %c0_38, %c0_39] : memref<1x8x128xf32, #tpu.memory_space<vmem>>, vector<1x8x128xf32>
    %67 = vector.shape_cast %66 : vector<1x8x128xf32> to vector<8x128xf32>
    %68 = vector.shape_cast %65 : vector<8x128xf32> to vector<1x8x128xf32>
    tpu.vector_store %arg10[%c0_37, %c0_38, %c0_39], %68 {strides = array<i32>} : memref<1x8x128xf32, #tpu.memory_space<vmem>>, vector<1x8x128xf32>,
    return
  }
  func.func @transform_0(%arg0: i32) -> (i32, i32, i32) {
    %c0_i32 = arith.constant 0 : i32
    %c0_i32_0 = arith.constant 0 : i32
    %c0_i32_1 = arith.constant 0 : i32
    return %arg0, %c0_i32, %c0_i32_0 : i32, i32, i32
  }
  func.func @transform_1(%arg0: i32) -> (i32, i32, i32) {
    %c0_i32 = arith.constant 0 : i32
    %c0_i32_0 = arith.constant 0 : i32
    %c0_i32_1 = arith.constant 0 : i32
    return %arg0, %c0_i32, %c0_i32_0 : i32, i32, i32
  }
  func.func @transform_2(%arg0: i32) -> (i32, i32, i32) {
    %c0_i32 = arith.constant 0 : i32
    %c0_i32_0 = arith.constant 0 : i32
    %c0_i32_1 = arith.constant 0 : i32
    return %arg0, %c0_i32, %c0_i32_0 : i32, i32, i32
  }
  func.func @transform_3(%arg0: i32) -> (i32, i32, i32) {
    %c0_i32 = arith.constant 0 : i32
    %c0_i32_0 = arith.constant 0 : i32
    %c0_i32_1 = arith.constant 0 : i32
    return %arg0, %c0_i32, %c0_i32_0 : i32, i32, i32
  }
  func.func @transform_4(%arg0: i32) -> (i32, i32) {
    %c0_i32 = arith.constant 0 : i32
    %c0_i32_0 = arith.constant 0 : i32
    %c0_i32_1 = arith.constant 0 : i32
    return %c0_i32, %c0_i32_0 : i32, i32
  }
  func.func @transform_5(%arg0: i32) -> (i32, i32) {
    %c0_i32 = arith.constant 0 : i32
    %c0_i32_0 = arith.constant 0 : i32
    %c0_i32_1 = arith.constant 0 : i32
    return %c0_i32, %c0_i32_0 : i32, i32
  }
  func.func @transform_6(%arg0: i32) -> (i32, i32) {
    %c0_i32 = arith.constant 0 : i32
    %c0_i32_0 = arith.constant 0 : i32
    %c0_i32_1 = arith.constant 0 : i32
    return %c0_i32, %c0_i32_0 : i32, i32
  }
  func.func @transform_7(%arg0: i32) -> (i32, i32, i32) {
    %c0_i32 = arith.constant 0 : i32
    %c0_i32_0 = arith.constant 0 : i32
    %c0_i32_1 = arith.constant 0 : i32
    %c0_i32_2 = arith.constant 0 : i32
    return %c0_i32, %c0_i32_0, %c0_i32_1 : i32, i32, i32
  }
  func.func @transform_8(%arg0: i32) -> (i32, i32) {
    %c0_i32 = arith.constant 0 : i32
    %c0_i32_0 = arith.constant 0 : i32
    %c0_i32_1 = arith.constant 0 : i32
    return %c0_i32, %c0_i32_0 : i32, i32
  }
  func.func @transform_9(%arg0: i32) -> (i32, i32, i32) {
    %c0_i32 = arith.constant 0 : i32
    %c0_i32_0 = arith.constant 0 : i32
    %c0_i32_1 = arith.constant 0 : i32
    return %arg0, %c0_i32, %c0_i32_0 : i32, i32, i32
  }
}

</mosaic_0001>

<bundles_post_ra>
// kernel: self_att_forward.4
= control target key start
LH: loop header
LB: loop body
LE: loop exit
PB: predicated region body
PF: predicated region fallthrough
CT: control target
= control target key end

     0   :  { %8 = vsyncpa [#allocation3], 0  ;;  %s453_s0 = inlined_call_operand.hbm [shape: f32[16,128], index: 0, kind: input, shape index: {}]   ;;  %s454_s1 = inlined_call_operand.hbm [shape: f32[128,32], index: 1, kind: input, shape index: {}]   ;;  %s455_s2 = inlined_call_operand.hbm [shape: f32[1,32], index: 2, kind: input, shape index: {}]   ;;  %s456_s3 = inlined_call_operand.hbm [shape: f32[16,32], index: 3, kind: output, shape index: {}]  }
   0x1   :  { %9 = vsyncpa [#allocation6], 0 }
   0x2   :  { %10 = vsyncpa [#allocation4], 0  ;;  %s363_s12 = smov [#allocation5]   ;;  %s364_s14 = smov [#allocation2]  }
   0x3   :  { %s28_s13 = sshll.u32 %s363_s12, 4  ;;  %s16_s15 = sshll.u32 %s364_s14, 4  ;;  %s29_s13 = int_to_ptr.vmem [resolvable:$true] %s28_s13  ;;  %s389_s15 = int_to_ptr.vmem [resolvable:$true] %s16_s15 }
   0x4   :  { %s269_s18 = scalar_lea.hbm %s454_s1, 2048 }
   0x5   :  { %p270_p0 = scmp.ne.s32.totalorder %s454_s1, %s269_s18  ;;  %p273_p1 = scmp.lt.u32.totalorder %s269_s18, %s454_s1 }
   0x7   :  { %p275_p2 = pnand %p273_p1, %p270_p0 }
   0x9   :  { %278 = shalt.err (!%p275_p2)
}
   0xa   :  { %s279_s23 = scalar_lea.vmem %s29_s13, 2048  ;;  %p284_p4 = scmp.lt.s32.totalorder %s29_s13, %s29_s13 }
   0xb   :  { %p280_p3 = scmp.ne.s32.totalorder %s29_s13, %s279_s23  ;;  %p285_p5 = scmp.lt.s32.totalorder %s279_s23, %s279_s23 }
   0xd   :  { %p286_p6 = por %p285_p5, %p284_p4 }
   0xf   :  { %p287_p7 = pnand %p286_p6, %p280_p3 }
  0x11   :  { %290 = shalt.err (!%p287_p7)
}
  0x12   :  { %s365_s24 = smov 128   ;;  %s366_s25 = smov 8  }
  0x13   :  { %34 = dma.hbm_to_vmem [thread:$0]  %s454_s1, 2048, %s29_s13, [#allocation6], %s365_s24, %s365_s24, %s366_s25  }
  0x14   :  { %s291_s30 = scalar_lea.hbm %s453_s0, 256 }
  0x15   :  { %p292_p8 = scmp.ne.s32.totalorder %s453_s0, %s291_s30  ;;  %p295_p9 = scmp.lt.u32.totalorder %s291_s30, %s453_s0 }
  0x17   :  { %p297_p10 = pnand %p295_p9, %p292_p8 }
  0x19   :  { %300 = shalt.err (!%p297_p10)
}
  0x1a   :  { %s301_s8 = scalar_lea.vmem %s389_s15, 256  ;;  %p306_p12 = scmp.lt.s32.totalorder %s389_s15, %s389_s15 }
  0x1b   :  { %p302_p11 = scmp.ne.s32.totalorder %s389_s15, %s301_s8  ;;  %p307_p13 = scmp.lt.s32.totalorder %s301_s8, %s301_s8 }
  0x1d   :  { %p308_p0 = por %p307_p13, %p306_p12 }
  0x1f   :  { %p309_p1 = pnand %p308_p0, %p302_p11 }
  0x21   :  { %312 = shalt.err (!%p309_p1)
}
  0x22   :  { %22 = dma.hbm_to_vmem [thread:$0]  %s453_s0, 256, %s389_s15, [#allocation3], %s365_s24, %s365_s24, %s366_s25  }
  0x23   :  { %s367_s10 = smov [#allocation7]   ;;  %s313_s14 = scalar_lea.hbm %s455_s2, 16 }
  0x24   :  { %s41_s11 = sshll.u32 %s367_s10, 4  ;;  %p314_p2 = scmp.ne.s32.totalorder %s455_s2, %s313_s14  ;;  %s42_s11 = int_to_ptr.vmem [resolvable:$true] %s41_s11 }
  0x25   :  { %p317_p3 = scmp.lt.u32.totalorder %s313_s14, %s455_s2 }
  0x27   :  { %p319_p4 = pnand %p317_p3, %p314_p2 }
  0x29   :  { %322 = shalt.err (!%p319_p4)
}
  0x2a   :  { %s323_s20 = scalar_lea.vmem %s42_s11, 16  ;;  %s327_s0 = scalar_lea.vmem %s42_s11, 32 }
  0x2b   :  { %p324_p5 = scmp.ne.s32.totalorder %s42_s11, %s323_s20  ;;  %p328_p6 = scmp.lt.s32.totalorder %s42_s11, %s42_s11 }
  0x2c   :  { %p329_p7 = scmp.lt.s32.totalorder %s327_s0, %s323_s20 }
  0x2e   :  { %p330_p8 = por %p329_p7, %p328_p6 }
  0x30   :  { %p331_p9 = pnand %p330_p8, %p324_p5 }
  0x32   :  { %334 = shalt.err (!%p331_p9)
}
  0x33   :  { %44 = dma.hbm_to_vmem [thread:$0]  %s455_s2, 16, %s42_s11, [#allocation6]  }
  0x34   :  { %357 = dma.done.wait [#allocation3], 256  }
  0x35   :  { %358 = vsyncadd [#allocation3], 4294967040 }
  0x36   :  { %359 = dma.done.wait [#allocation6], 2064  }
  0x37   :  { %360 = vsyncadd [#allocation6], 4294965232  ;;  %v56_v0 = vld [vmem:[#allocation5] sm:$0xff]  ;;  %v57_v1 = vld [vmem:[#allocation5 + $0x8] sm:$0xff]  ;;  %s368_s2 = smov [#allocation8]   ;;  %vm156_vm0 = vcmask 261120  }
  0x38   :  { %v58_v2 = vld [vmem:[#allocation5 + $0x10] sm:$0xff]  ;;  %v231_v3 = vpack.c.bf16 %v57_v1, %v56_v0  ;;  %v59_v4 = vld [vmem:[#allocation5 + $0x18] sm:$0xff]  ;;  %v60_v6 = vld [vmem:[#allocation5 + $0x20] sm:$0xff]  ;;  %s164_s22 = sshll.u32 %s368_s2, 4  ;;  %s165_s22 = int_to_ptr.vmem [resolvable:$true] %s164_s22 }
  0x39   :  { %v235_v5 = vpack.c.bf16 %v59_v4, %v58_v2  ;;  %v61_v7 = vld [vmem:[#allocation5 + $0x28] sm:$0xff]  ;;  %v54_v9 = vld [vmem:[#allocation2] sm:$0xff]  ;;  %v63_v11 = vld [vmem:[#allocation5 + $0x38] sm:$0xff]  ;;  %s335_s23 = scalar_lea.vmem %s165_s22, 256  ;;  %p340_p11 = scmp.lt.s32.totalorder %s165_s22, %s165_s22 }
  0x3a   :  { %232 = vmatprep.subr.bf16.mxu0 %v231_v3  ;;  %v239_v8 = vpack.c.bf16 %v61_v7, %v60_v6  ;;  %v62_v10 = vld [vmem:[#allocation5 + $0x30] sm:$0xff]  ;;  %228 = vmatprep.mubr.f32.mxu0 %v54_v9  ;;  %v64_v13 = vld [vmem:[#allocation5 + $0x40] sm:$0xff]  ;;  %v65_v14 = vld [vmem:[#allocation5 + $0x48] sm:$0xff]  ;;  %p336_p10 = scmp.ne.s32.totalorder %s165_s22, %s335_s23  ;;  %p341_p12 = scmp.lt.s32.totalorder %s335_s23, %s335_s23 }
  0x3b   :  { %234 = vmatpush3.bf16.msra.mxu0 %v231_v3  ;;  %v243_v12 = vpack.c.bf16 %v63_v11, %v62_v10  ;;  %v247_v15 = vpack.c.bf16 %v65_v14, %v64_v13  ;;  %v66_v16 = vld [vmem:[#allocation5 + $0x50] sm:$0xff]  ;;  %v67_v17 = vld [vmem:[#allocation5 + $0x58] sm:$0xff]  ;;  %v68_v19 = vld [vmem:[#allocation5 + $0x60] sm:$0xff] }
  0x3c   :  { %236 = vmatprep.subr.bf16.mxu0 %v235_v5  ;;  %v251_v18 = vpack.c.bf16 %v67_v17, %v66_v16  ;;  %v69_v20 = vld [vmem:[#allocation5 + $0x68] sm:$0xff]  ;;  %v70_v22 = vld [vmem:[#allocation5 + $0x70] sm:$0xff]  ;;  %v71_v23 = vld [vmem:[#allocation5 + $0x78] sm:$0xff]  ;;  %p342_p13 = por %p341_p12, %p340_p11 }
  0x3d   :  { %v255_v21 = vpack.c.bf16 %v69_v20, %v68_v19  ;;  %v259_v24 = vpack.c.bf16 %v71_v23, %v70_v22  ;;  %v55_v25 = vld [vmem:[#allocation2 + $0x8] sm:$0xff]  ;;  %v177_v26 = vld [vmem:[#allocation7] ss:$0 sm:$0xff] }
  0x3e   :  { %p343_p0 = pnand %p342_p13, %p336_p10 }
  0x3f   :  { %238 = vmatpush3.bf16.msra.mxu0 %v235_v5 }
  0x40   :  { %240 = vmatprep.subr.bf16.mxu0 %v239_v8 }
  0x43   :  { %242 = vmatpush3.bf16.msra.mxu0 %v239_v8 }
  0x44   :  { %244 = vmatprep.subr.bf16.mxu0 %v243_v12 }
  0x47   :  { %246 = vmatpush3.bf16.msra.mxu0 %v243_v12 }
  0x48   :  { %248 = vmatprep.subr.bf16.mxu0 %v247_v15 }
  0x4b   :  { %250 = vmatpush3.bf16.msra.mxu0 %v247_v15 }
  0x4c   :  { %252 = vmatprep.subr.bf16.mxu0 %v251_v18 }
  0x4f   :  { %254 = vmatpush3.bf16.msra.mxu0 %v251_v18 }
  0x50   :  { %256 = vmatprep.subr.bf16.mxu0 %v255_v21 }
  0x53   :  { %258 = vmatpush3.bf16.msra.mxu0 %v255_v21 }
  0x54   :  { %260 = vmatprep.subr.bf16.mxu0 %v259_v24 }
  0x57   :  { %262 = vmatpush3.bf16.msra.mxu0 %v259_v24 }
  0x5a   :  { %229 = vmatmul.mubr.f32.vlgmr.msra.gmra.mrb[0].mxu0 %v55_v25 }
 0x12d   :  { %v230_v27 = vpop.f32.mrb[0].mxu0 }
 0x12e   :  { %v151_v28 = vadd.f32 %v230_v27, %v177_v26  ;;  %v145_v29 = vpop.f32.mrb[1].mxu0 }
 0x12f   :  { %v146_v30 = vadd.f32 %v177_v26, %v145_v29 }
 0x130   :  { %v155_v31 = vmax.f32 %v151_v28, 0.0 }
 0x131   :  { %v154_v32 = vmax.f32 %v146_v30, 0.0 }
 0x132   :  { %158 = vst.msk [vmem:[#allocation8 + $0x8] sm:$0xff] %vm156_vm0, %v155_v31 }
 0x133   :  { %157 = vst.msk [vmem:[#allocation8] sm:$0xff] %vm156_vm0, %v154_v32 }
 0x134   :  { %346 = shalt.err (!%p343_p0)
}
 0x135   :  { %s347_s28 = scalar_lea.hbm %s456_s3, 256 }
 0x136   :  { %p348_p1 = scmp.ne.s32.totalorder %s456_s3, %s347_s28  ;;  %p351_p2 = scmp.lt.u32.totalorder %s347_s28, %s456_s3 }
 0x138   :  { %p353_p3 = pnand %p351_p2, %p348_p1 }
 0x13a   :  { %356 = shalt.err (!%p353_p3)
}
 0x13b   :  { %170 = dma.vmem_to_hbm [thread:$0]  %s165_s22, 256, %s456_s3, [#allocation4], %s365_s24, %s365_s24, %s366_s25  }
 0x13c   :  { %361 = dma.done.wait [#allocation4], 256  }
 0x13d   :  { %362 = vsyncadd [#allocation4], 4294967040 }
 0x13e   :  { %174 = vsyncpa [#allocation3], 1 }
 0x13f   :  { %175 = vsyncpa [#allocation6], 1 }
 0x140   :  { %176 = vsyncpa [#allocation4], 1 }

// kernel: self_att_forward.5
= control target key start
LH: loop header
LB: loop body
LE: loop exit
PB: predicated region body
PF: predicated region fallthrough
CT: control target
= control target key end

     0   :  { %8 = vsyncpa [#allocation3], 0  ;;  %s388_s0 = inlined_call_operand.hbm [shape: f32[16,32], index: 0, kind: input, shape index: {}]   ;;  %s389_s1 = inlined_call_operand.hbm [shape: f32[32,96], index: 1, kind: input, shape index: {}]   ;;  %s390_s2 = inlined_call_operand.hbm [shape: f32[1,96], index: 2, kind: input, shape index: {}]   ;;  %s391_s3 = inlined_call_operand.hbm [shape: f32[16,96], index: 3, kind: output, shape index: {}]  }
   0x1   :  { %9 = vsyncpa [#allocation6], 0 }
   0x2   :  { %10 = vsyncpa [#allocation4], 0  ;;  %s298_s12 = smov [#allocation5]   ;;  %s299_s14 = smov [#allocation2]  }
   0x3   :  { %s28_s13 = sshll.u32 %s298_s12, 4  ;;  %s16_s15 = sshll.u32 %s299_s14, 4  ;;  %s29_s13 = int_to_ptr.vmem [resolvable:$true] %s28_s13  ;;  %s324_s15 = int_to_ptr.vmem [resolvable:$true] %s16_s15 }
   0x4   :  { %s204_s18 = scalar_lea.hbm %s389_s1, 512 }
   0x5   :  { %p205_p0 = scmp.ne.s32.totalorder %s389_s1, %s204_s18  ;;  %p208_p1 = scmp.lt.u32.totalorder %s204_s18, %s389_s1 }
   0x7   :  { %p210_p2 = pnand %p208_p1, %p205_p0 }
   0x9   :  { %213 = shalt.err (!%p210_p2)
}
   0xa   :  { %s214_s23 = scalar_lea.vmem %s29_s13, 512  ;;  %p219_p4 = scmp.lt.s32.totalorder %s29_s13, %s29_s13 }
   0xb   :  { %p215_p3 = scmp.ne.s32.totalorder %s29_s13, %s214_s23  ;;  %p220_p5 = scmp.lt.s32.totalorder %s214_s23, %s214_s23 }
   0xd   :  { %p221_p6 = por %p220_p5, %p219_p4 }
   0xf   :  { %p222_p7 = pnand %p221_p6, %p215_p3 }
  0x11   :  { %225 = shalt.err (!%p222_p7)
}
  0x12   :  { %s300_s24 = smov 128   ;;  %s301_s25 = smov 8  }
  0x13   :  { %34 = dma.hbm_to_vmem [thread:$0]  %s389_s1, 512, %s29_s13, [#allocation6], %s300_s24, %s300_s24, %s301_s25  }
  0x14   :  { %s226_s30 = scalar_lea.hbm %s388_s0, 256 }
  0x15   :  { %p227_p8 = scmp.ne.s32.totalorder %s388_s0, %s226_s30  ;;  %p230_p9 = scmp.lt.u32.totalorder %s226_s30, %s388_s0 }
  0x17   :  { %p232_p10 = pnand %p230_p9, %p227_p8 }
  0x19   :  { %235 = shalt.err (!%p232_p10)
}
  0x1a   :  { %s236_s8 = scalar_lea.vmem %s324_s15, 256  ;;  %p241_p12 = scmp.lt.s32.totalorder %s324_s15, %s324_s15 }
  0x1b   :  { %p237_p11 = scmp.ne.s32.totalorder %s324_s15, %s236_s8  ;;  %p242_p13 = scmp.lt.s32.totalorder %s236_s8, %s236_s8 }
  0x1d   :  { %p243_p0 = por %p242_p13, %p241_p12 }
  0x1f   :  { %p244_p1 = pnand %p243_p0, %p237_p11 }
  0x21   :  { %247 = shalt.err (!%p244_p1)
}
  0x22   :  { %22 = dma.hbm_to_vmem [thread:$0]  %s388_s0, 256, %s324_s15, [#allocation3], %s300_s24, %s300_s24, %s301_s25  }
  0x23   :  { %s302_s10 = smov [#allocation7]   ;;  %s248_s14 = scalar_lea.hbm %s390_s2, 16 }
  0x24   :  { %s41_s11 = sshll.u32 %s302_s10, 4  ;;  %p249_p2 = scmp.ne.s32.totalorder %s390_s2, %s248_s14  ;;  %s42_s11 = int_to_ptr.vmem [resolvable:$true] %s41_s11 }
  0x25   :  { %p252_p3 = scmp.lt.u32.totalorder %s248_s14, %s390_s2 }
  0x27   :  { %p254_p4 = pnand %p252_p3, %p249_p2 }
  0x29   :  { %257 = shalt.err (!%p254_p4)
}
  0x2a   :  { %s258_s20 = scalar_lea.vmem %s42_s11, 16  ;;  %s262_s0 = scalar_lea.vmem %s42_s11, 32 }
  0x2b   :  { %p259_p5 = scmp.ne.s32.totalorder %s42_s11, %s258_s20  ;;  %p263_p6 = scmp.lt.s32.totalorder %s42_s11, %s42_s11 }
  0x2c   :  { %p264_p7 = scmp.lt.s32.totalorder %s262_s0, %s258_s20 }
  0x2e   :  { %p265_p8 = por %p264_p7, %p263_p6 }
  0x30   :  { %p266_p9 = pnand %p265_p8, %p259_p5 }
  0x32   :  { %269 = shalt.err (!%p266_p9)
}
  0x33   :  { %44 = dma.hbm_to_vmem [thread:$0]  %s390_s2, 16, %s42_s11, [#allocation6]  }
  0x34   :  { %292 = dma.done.wait [#allocation3], 256  }
  0x35   :  { %293 = vsyncadd [#allocation3], 4294967040 }
  0x36   :  { %294 = dma.done.wait [#allocation6], 528  }
  0x37   :  { %295 = vsyncadd [#allocation6], 4294966768  ;;  %vm67_vm0 = vcmask 261120   ;;  %v56_v0 = vld [vmem:[#allocation5] sm:$0xff]  ;;  %v57_v1 = vld [vmem:[#allocation5 + $0x8] sm:$0xff]  ;;  %s303_s2 = smov [#allocation8]  }
  0x38   :  { %v58_v2 = vld [vmem:[#allocation5 + $0x10] sm:$0xff]  ;;  %v190_v3 = vpack.c.bf16 %v57_v1, %v56_v0  ;;  %v59_v4 = vld [vmem:[#allocation5 + $0x18] sm:$0xff]  ;;  %v170_v8 = vld [vmem:[#allocation7] ss:$0 sm:$0xff]  ;;  %s157_s22 = sshll.u32 %s303_s2, 4  ;;  %vm149_vm1 = vcmask 785408   ;;  %s158_s22 = int_to_ptr.vmem [resolvable:$true] %s157_s22 }
  0x39   :  { %v54_v5 = vld [vmem:[#allocation2] sm:$0xff]  ;;  %v194_v6 = vpack.c.bf16 %v59_v4, %v58_v2  ;;  %v55_v7 = vld [vmem:[#allocation2 + $0x8] sm:$0xff]  ;;  %s270_s23 = scalar_lea.vmem %s158_s22, 256  ;;  %p275_p11 = scmp.lt.s32.totalorder %s158_s22, %s158_s22 }
  0x3a   :  { %187 = vmatprep.mubr.msk.f32.mxu0 %vm67_vm0, %v54_v5  ;;  %191 = vmatprep.subr.bf16.mxu0 %v190_v3  ;;  %p271_p10 = scmp.ne.s32.totalorder %s158_s22, %s270_s23  ;;  %p276_p12 = scmp.lt.s32.totalorder %s270_s23, %s270_s23 }
  0x3b   :  { %193 = vmatpush3.bf16.msra.mxu0 %v190_v3 }
  0x3c   :  { %195 = vmatprep.subr.bf16.mxu0 %v194_v6  ;;  %p277_p13 = por %p276_p12, %p275_p11 }
  0x3e   :  { %p278_p0 = pnand %p277_p13, %p271_p10 }
  0x3f   :  { %197 = vmatpush3.bf16.msra.mxu0 %v194_v6 }
  0x42   :  { %188 = vmatmul.mubr.msk.f32.vlgmr.msra.gmra.mrb[0].mxu0 %vm67_vm0, %v55_v7 }
 0x115   :  { %v189_v9 = vpop.f32.mrb[0].mxu0 }
 0x116   :  { %v146_v10 = vadd.f32 %v189_v9, %v170_v8  ;;  %v140_v11 = vpop.f32.mrb[1].mxu0 }
 0x117   :  { %v141_v12 = vadd.f32 %v170_v8, %v140_v11 }
 0x118   :  { %151 = vst.msk [vmem:[#allocation8 + $0x8] sm:$0xff] %vm149_vm1, %v146_v10 }
 0x119   :  { %150 = vst.msk [vmem:[#allocation8] sm:$0xff] %vm149_vm1, %v141_v12 }
 0x11a   :  { %281 = shalt.err (!%p278_p0)
}
 0x11b   :  { %s282_s28 = scalar_lea.hbm %s391_s3, 256 }
 0x11c   :  { %p283_p1 = scmp.ne.s32.totalorder %s391_s3, %s282_s28  ;;  %p286_p2 = scmp.lt.u32.totalorder %s282_s28, %s391_s3 }
 0x11e   :  { %p288_p3 = pnand %p286_p2, %p283_p1 }
 0x120   :  { %291 = shalt.err (!%p288_p3)
}
 0x121   :  { %163 = dma.vmem_to_hbm [thread:$0]  %s158_s22, 256, %s391_s3, [#allocation4], %s300_s24, %s300_s24, %s301_s25  }
 0x122   :  { %296 = dma.done.wait [#allocation4], 256  }
 0x123   :  { %297 = vsyncadd [#allocation4], 4294967040 }
 0x124   :  { %167 = vsyncpa [#allocation3], 1 }
 0x125   :  { %168 = vsyncpa [#allocation6], 1 }
 0x126   :  { %169 = vsyncpa [#allocation4], 1 }

// kernel: self_att_forward.6
= control target key start
LH: loop header
LB: loop body
LE: loop exit
PB: predicated region body
PF: predicated region fallthrough
CT: control target
= control target key end

     0   :  { %v567_v15 = vmov 0.0   ;;  %s569_s23 = smov 0   ;;  %s623_s0 = inlined_call_operand.vmem [shape: f32[8,2,32], index: 0, kind: input, shape index: {}]   ;;  %s624_s1 = inlined_call_operand.vmem [shape: f32[8,2,32], index: 1, kind: input, shape index: {}]   ;;  %s625_s2 = inlined_call_operand.vmem [shape: f32[8,2,32], index: 2, kind: input, shape index: {}]   ;;  %s626_s3 = inlined_call_operand.vmem [shape: f32[3,32,32], index: 3, kind: input, shape index: {}]   ;;  %s627_s5 = inlined_call_operand.vmem [shape: f32[8,2,32], index: 5, kind: output, shape index: {}]   ;;  %s628_s4 = inlined_call_operand.vmem [shape: f32[3,1,32], index: 4, kind: input, shape index: {}]  }
   0x1   :  { %v495_v0 = vld [vmem:[%s626_s3] sm:$0xff]  ;;  %v500_v1 = vld [vmem:[%s626_s3 + $0x8] sm:$0xff]  ;;  %v505_v2 = vld [vmem:[%s626_s3 + $0x10] sm:$0xff] }
   0x2   :  { %v510_v3 = vld [vmem:[%s626_s3 + $0x18] sm:$0xff]  ;;  %v515_v4 = vld [vmem:[%s626_s3 + $0x20] sm:$0xff]  ;;  %v520_v5 = vld [vmem:[%s626_s3 + $0x28] sm:$0xff] }
   0x3   :  { %v525_v6 = vld [vmem:[%s626_s3 + $0x30] sm:$0xff]  ;;  %v530_v7 = vld [vmem:[%s626_s3 + $0x38] sm:$0xff]  ;;  %v535_v8 = vld [vmem:[%s626_s3 + $0x40] sm:$0xff] }
   0x4   :  { %v540_v9 = vld [vmem:[%s626_s3 + $0x48] sm:$0xff]  ;;  %v545_v10 = vld [vmem:[%s626_s3 + $0x50] sm:$0xff]  ;;  %v550_v11 = vld [vmem:[%s626_s3 + $0x58] sm:$0xff] }
   0x5   :  { %v555_v12 = vld [vmem:[%s628_s4] ss:$0 sm:$0xff]  ;;  %v560_v13 = vld [vmem:[%s628_s4 + $0x1] ss:$0 sm:$0xff]  ;;  %v565_v14 = vld [vmem:[%s628_s4 + $0x2] ss:$0 sm:$0xff] }
   0x6 LB: > { %v397_v16 = vpack.c.bf16 %v500_v1, %v495_v0  ;;  %v459_v17 = vmov 0.0|0.0   ;;  %v403_v18 = vpack.c.bf16 %v520_v5, %v515_v4  ;;  %v400_v19 = vpack.c.bf16 %v510_v3, %v505_v2  ;;  %s596_s3 = sshll.u32 %s457_s23, 1  ;;  %s44_s23 = sadd.s32 1, %s457_s23   ;;  %s457_s23 = sphi %s569_s23, %s44_s23   ;;  %v453_v15 = vphi %v567_v15, %v305_v15  }
   0x7   : > { %396 = vmatprep.subr.bf16.mxu0 %v459_v17  ;;  %402 = vmatprep.subr.bf16.mxu1 %v459_v17  ;;  %vm460_vm0 = vmmov 0   ;;  %v461_v20 = vmov 0.0   ;;  %v406_v21 = vpack.c.bf16 %v530_v7, %v525_v6  ;;  %vm52_vm1 = vcmask 261120   ;;  %s279_s25 = scalar_lea.vmem %s623_s0, %s596_s3  ;;  %s288_s28 = scalar_lea.vmem %s624_s1, %s596_s3 }
   0x8   : > { %398 = vmatpush3.bf16.msra.mxu0 %v397_v16  ;;  %371 = vmatprep.mubr.msk.f32.mxu0 %vm460_vm0, %v461_v20  ;;  %v409_v22 = vpack.c.bf16 %v540_v9, %v535_v8  ;;  %v412_v23 = vpack.c.bf16 %v550_v11, %v545_v10  ;;  %v280_v25 = vld [vmem:[%s279_s25] sm:$0x3]  ;;  %s297_s6 = scalar_lea.vmem %s625_s2, %s596_s3  ;;  %s306_s9 = scalar_lea.vmem %s627_s5, %s596_s3  ;;  %vm307_vm2 = vcmask 254976  }
   0x9   : > { %399 = vmatprep.subr.bf16.mxu0 %v459_v17  ;;  %404 = vmatpush3.bf16.msra.mxu1 %v403_v18  ;;  %v289_v29 = vld [vmem:[%s288_s28] sm:$0x3]  ;;  %p41_p0 = scmp.ge.s32.totalorder %s44_s23, 8  }
   0xa   : > { %405 = vmatprep.subr.bf16.mxu1 %v459_v17  ;;  %382 = vmatprep.mubr.msk.f32.mxu1 %vm460_vm0, %v461_v20  ;;  %v298_v44 = vld [vmem:[%s297_s6] sm:$0x3] }
   0xc   : > { %401 = vmatpush3.bf16.msra.mxu0 %v400_v19 }
   0xd   : > { %407 = vmatpush3.bf16.msra.mxu1 %v406_v21  ;;  %408 = vmatprep.subr.bf16.mxu0 %v459_v17 }
   0xf   : > { %372 = vmatmul.mubr.msk.f32.vlgmr.msra.gmra.mrb[0].mxu0 %vm52_vm1, %v453_v15 }
  0x10   : > { %383 = vmatmul.mubr.msk.f32.vlgmr.msra.gmra.mrb[0].mxu1 %vm52_vm1, %v453_v15  ;;  %410 = vmatpush3.bf16.msra.mxu0 %v409_v22 }
  0x11   : > { %411 = vmatprep.subr.bf16.mxu0 %v459_v17  ;;  %393 = vmatprep.mubr.msk.f32.mxu0 %vm460_vm0, %v461_v20 }
  0x14   : > { %413 = vmatpush3.bf16.msra.mxu0 %v412_v23 }
  0x17   : > { %394 = vmatmul.mubr.msk.f32.vlgmr.msra.gmra.mrb[2].mxu0 %vm52_vm1, %v453_v15 }
  0xe2   : > { %v122_v24 = vpop.f32.mrb[0].mxu0 }
  0xe3   : > { %v123_v26 = vadd.f32 %v555_v12, %v122_v24  ;;  %v373_v27 = vpop.f32.mrb[1].mxu0  ;;  %v198_v28 = vpop.f32.mrb[0].mxu1 }
  0xe4   : > { %v199_v30 = vadd.f32 %v560_v13, %v198_v28  ;;  %v384_v31 = vpop.f32.mrb[1].mxu1 }
  0xe5   : > { %v281_v32 = vadd.f32 %v280_v25, %v123_v26 }
  0xe6   : > { %v290_v33 = vadd.f32 %v289_v29, %v199_v30 }
  0xe7   : > { %v346_v34 = vmul.f32 -1.442695, %v281_v32 }
  0xe8   : > { %v347_v35 = vmul.f32 -1.442695, %v290_v33 }
  0xe9   : > { %433 = vpow2.f32 %v346_v34 }
  0xea   : > { %v274_v36 = vpop.f32.mrb[2].mxu0  ;;  %435 = vpow2.f32 %v347_v35 }
  0xeb   : > { %v395_v37 = vpop.f32.mrb[3].mxu0  ;;  %v275_v42 = vadd.f32 %v565_v14, %v274_v36 }
  0xf3   : > { %v434_v38 = vpop.eup %433 }
  0xf4   : > { %v285_v39 = vadd.f32 1.0, %v434_v38  ;;  %v436_v40 = vpop.eup %435 }
  0xf5   : > { %v294_v41 = vadd.f32 1.0, %v436_v40 }
  0xf6   : > { %437 = vrcp.f32 %v285_v39 }
  0xf7   : > { %439 = vrcp.f32 %v294_v41 }
 0x100   : > { %v438_v43 = vpop.eup %437 }
 0x101   : > { %v299_v45 = vmul.f32 %v438_v43, %v275_v42  ;;  %v440_v47 = vpop.eup %439 }
 0x102   : > { %v302_v48 = vsub.f32 1.0, %v440_v47  ;;  %v304_v50 = vmul.f32 %v453_v15, %v440_v47 }
 0x103   : > { %v300_v46 = vadd.f32 %v299_v45, %v298_v44 }
 0x105   : > { %441 = vtanh.f32 %v300_v46 }
 0x10e   :  { %43 = sbr.rel (!%p41_p0) target bundleno = 6 (0x6), region = 55 }
 0x10f   : > { %v442_v49 = vpop.eup %441 }
 0x110   : > { %v303_v51 = vmul.f32 %v442_v49, %v302_v48 }
 0x112   : > { %v305_v15 = vadd.f32 %v304_v50, %v303_v51  }
 0x114   : > { %308 = vst.msk [vmem:[%s306_s9] sm:$0x3] %vm307_vm2, %v305_v15 }

// kernel: self_att_forward.7
= control target key start
LH: loop header
LB: loop body
LE: loop exit
PB: predicated region body
PF: predicated region fallthrough
CT: control target
= control target key end

     0   :  { %s1502_s0 = inlined_call_operand.vmem [shape: f32[2,1,8], index: 0, kind: input, shape index: {}]   ;;  %s1503_s1 = inlined_call_operand.vmem [shape: f32[2,8,1], index: 1, kind: input, shape index: {}]   ;;  %s1504_s2 = inlined_call_operand.vmem [shape: f32[2,8,32], index: 2, kind: input, shape index: {}]   ;;  %s1505_s3 = inlined_call_operand.vmem [shape: f32[2,8,128], index: 3, kind: input, shape index: {}]   ;;  %s1506_s4 = inlined_call_operand.vmem [shape: f32[1,32], index: 4, kind: input, shape index: {}]   ;;  %s1507_s5 = inlined_call_operand.vmem [shape: f32[1,32], index: 5, kind: input, shape index: {}]   ;;  %s1508_s6 = inlined_call_operand.vmem [shape: f32[1,32], index: 6, kind: input, shape index: {}]   ;;  %s1509_s7 = inlined_call_operand.vmem [shape: f32[3,32,128], index: 7, kind: input, shape index: {}]   ;;  %s1510_s8 = inlined_call_operand.vmem [shape: f32[1,128], index: 8, kind: input, shape index: {}]   ;;  %s1511_s9 = inlined_call_operand.hbm [shape: f32[2,8,128], index: 9, kind: output, shape index: {}]  }
   0x1   :  { %1512 = sst [smem:[#allocation5_spill]] %s1502_s0 }
   0x2   :  { %1513 = sst [smem:[#allocation6_spill]] %s1503_s1 }
   0x3   :  { %14 = vsyncpa [#allocation3], 0 }
   0x4   :  { %16 = vsyncpa [#allocation3 + $0x1], 0  ;;  %s1300_s30 = smov 0   ;;  %s1302_s10 = smov 0  }
   0x5   :  { %s1304_s11 = smov 0   ;;  %s1306_s12 = smov 0  }
   0x6 LB: > { %s1321_s13 = sadd.s32 4294967295, %s1243_s12   ;;  %s1013_s14 = sadd.s32 4294967294, %s1243_s12   ;;  %s1243_s12 = sphi %s1306_s12, %s1521_s12   ;;  %s1239_s11 = sphi %s1304_s11, %s1520_s11   ;;  %s1235_s10 = sphi %s1302_s10, %s1519_s10   ;;  %s1231_s30 = sphi %s1300_s30, %s1518_s30  }
   0x7   : > { %s1325_s15 = sadd.s32 1, %s1243_s12   ;;  %s238_s16 = sadd.s32 1, %s1239_s11 }
   0x8   : > { %s235_s17 = ssub.s32 %s1243_s12, %s1325_s15  ;;  %p248_p0 = scmp.ne.s32.totalorder %s1239_s11, %s1235_s10 }
   0x9   : > { %p236_p1 = scmp.eq.s32.totalorder %s235_s17, 0  ;;  %p249_p2 = scmp.eq.s32.totalorder %s1321_s13, 1 }
   0xa   : > { %p254_p3 = scmp.ne.s32.totalorder %s1235_s10, %s1231_s30  ;;  %p255_p4 = scmp.eq.s32.totalorder %s1013_s14, 1 }
   0xb   : > { %s1336_s18 = scalar_select %p236_p1, %s1239_s11, %s238_s16  }
   0xc   : > { %p1338_p5 = por %p249_p2, %p248_p0  ;;  %p1342_p6 = por %p255_p4, %p254_p3 }
   0xd   : > { %p1016_p7 = scmp.ge.s32.totalorder %s1243_s12, 1  ;;  %p315_p8 = scmp.lt.s32.totalorder %s1243_s12, 3 }
   0xf   : > { %p316_p9 = pnand %p1016_p7, %p315_p8 }
  0x10   : > { %p361_p10 = scmp.lt.s32.totalorder (!%p316_p9), %s1321_s13, 1  ;;  %v1245_v0 = vmov (!%p316_p9), 0.0   ;;  %vm1246_vm0 = vmmov (!%p316_p9), 0   ;;  %v1247_v1 = vmov (!%p316_p9), 0   ;;  %vm393_vm1 = vcmask (!%p316_p9), 261120   ;;  %s1516_s1 = sld [smem:[#allocation6_spill]] (!%p316_p9) }
  0x11   : > { %319 = sbr.rel (%p316_p9) target bundleno = 1014 (0x3f6), region = 56  ;;  %1067 = vmatprep.subr.mxu0 (!%p316_p9), %v1245_v0  ;;  %1072 = vmatprep.subr.mxu1 (!%p316_p9), %v1245_v0  ;;  %v1021_v2 = vld [vmem:[%s1508_s6] ss:$0 sm:$0xff] (!%p316_p9)  ;;  %v547_v10 = vlaneseq (!%p316_p9)  ;;  %s1517_s0 = sld [smem:[#allocation5_spill]] (!%p316_p9)  ;;  %vm578_vm3 = vcmask (!%p316_p9), 64512   ;;  %v1031_v38 = vld [vmem:[%s1509_s7 + $0x28] sm:$0xff] (!%p316_p9) }
  0x12   : > { %1069 = vmatprep.mubr.msk.f32.mxu0 (!%p316_p9), %vm1246_vm0, %v1245_v0  ;;  %1074 = vmatprep.mubr.msk.f32.mxu1 (!%p316_p9), %vm1246_vm0, %v1245_v0  ;;  %v1022_v3 = vld [vmem:[%s1506_s4] ss:$0 sm:$0xff] (!%p316_p9)  ;;  %v1032_v39 = vld [vmem:[%s1509_s7 + $0x30] sm:$0xff] (!%p316_p9)  ;;  %v1248_v40 = vmov (!%p316_p9), 0.0|0.0   ;;  %v1033_v42 = vld [vmem:[%s1509_s7 + $0x38] sm:$0xff] (!%p316_p9)  ;;  %s1043_s26 = sshll.u32 (!%p316_p9), %s1321_s13, 7 }
  0x13   : > { %1176 = vset.pattern.permute.xlu0 (!%p316_p9), %v1247_v1  ;;  %v397_v5 = vld [vmem:[%s1507_s5] sm:$0x1] (!%p316_p9)  ;;  %v548_v12 = vshrl.u32 (!%p316_p9), %v547_v10, 7  ;;  %v555_v13 = vand.u32 (!%p316_p9), 127, %v547_v10  ;;  %v1119_v43 = vpack.c.bf16 (!%p316_p9), %v1033_v42, %v1032_v39  ;;  %v1037_v45 = vld [vmem:[%s1509_s7 + $0x48] sm:$0xff] (!%p316_p9)  ;;  %v665_v53 = vld [vmem:[%s1509_s7 + $0x10] sm:$0xff] (!%p316_p9) }
  0x14   : > { %v1030_v37 = vld [vmem:[%s1509_s7 + $0x20] sm:$0xff] (!%p316_p9)  ;;  %v664_v49 = vld [vmem:[%s1509_s7 + $0x8] sm:$0xff] (!%p316_p9)  ;;  %v666_v54 = vld [vmem:[%s1509_s7 + $0x18] sm:$0xff] (!%p316_p9) }
  0x15   : > { %vm556_vm2 = vcmp.ne.s32.totalorder (!%p316_p9), %v548_v12, %v555_v13  ;;  %v549_v19 = vsub.s32 (!%p316_p9), 0, %v548_v12  ;;  %v1116_v41 = vpack.c.bf16 (!%p316_p9), %v1031_v38, %v1030_v37  ;;  %v1036_v44 = vld [vmem:[%s1509_s7 + $0x40] sm:$0xff] (!%p316_p9)  ;;  %v1125_v55 = vpack.c.bf16 (!%p316_p9), %v666_v54, %v665_v53  ;;  %v1038_v56 = vld [vmem:[%s1509_s7 + $0x50] sm:$0xff] (!%p316_p9)  ;;  %v1039_v57 = vld [vmem:[%s1509_s7 + $0x58] sm:$0xff] (!%p316_p9) }
  0x16   : > { %v1027_v17 = vsel (!%p316_p9), %vm556_vm2, 1.0, %v1245_v0  ;;  %v1128_v46 = vpack.c.bf16 (!%p316_p9), %v1037_v45, %v1036_v44  ;;  %v663_v48 = vld [vmem:[%s1509_s7] sm:$0xff] (!%p316_p9)  ;;  %v1131_v58 = vpack.c.bf16 (!%p316_p9), %v1039_v57, %v1038_v56 }
  0x17   : > { %v1122_v51 = vpack.c.bf16 (!%p316_p9), %v664_v49, %v663_v48 }
  0x18   : > { %s1352_s21 = scalar_select %p361_p10, %s1321_s13, 1 }
  0x19   : > { %s1249_s13 = smov [#allocation2]  }
  0x1a   : > { %s1359_s22 = sshll.u32 %s1352_s21, 3  ;;  %s363_s27 = scalar_lea.vmem %s1517_s0, %s1352_s21 }
  0x1b   : > { %s371_s29 = scalar_lea.vmem %s1504_s2, %s1359_s22  ;;  %s367_s24 = scalar_lea.vmem %s1516_s1, %s1359_s22  ;;  %v1028_v15 = vld [vmem:[%s363_s27] ss:$0 sm:$0xff] }
  0x1c   : > { %v1371_v4 = vld [vmem:[%s371_s29] sm:$0xff]  ;;  %s358_s29 = sand.u32 1, %s1235_s10   ;;  %s375_s25 = scalar_lea.vmem %s1505_s3, %s1359_s22 }
  0x1d   : > { %1068 = vmatpush3.xpose.msk.msra.mxu0 %vm393_vm1, %v1371_v4  ;;  %1073 = vmatpush3.xpose.msk.msra.mxu1 %vm393_vm1, %v1371_v4  ;;  %v384_v6 = vmul.f32 %v1021_v2, %v1371_v4  ;;  %v392_v7 = vmul.f32 %v1022_v3, %v1371_v4  ;;  %v559_v9 = vld [vmem:[%s367_s24] sm:$0xff]  ;;  %s1017_s14 = sshll.u32 %s358_s29, 3  ;;  %s1460_s1 = scalar_lea.hbm %s1511_s9, %s1043_s26 }
  0x1e   : > { %1077 = vmatprep.subr.mxu0 %v1245_v0  ;;  %1115 = vmatprep.subr.bf16.mxu1 %v1248_v40  ;;  %s360_s27 = scalar_lea.vmem [#allocation2], %s1017_s14  ;;  %s908_s22 = scalar_lea.sflag [#allocation3], %s358_s29 }
  0x1f   : > { %v394_v8 = vsel %vm393_vm1, %v392_v7, 0.0  ;;  %s921_s21 = sshll.u32 %s360_s27, 4  ;;  %s1185_s14 = sshll.u32 %s1249_s13, 4  ;;  %s1462_s21 = int_to_ptr.vmem [resolvable:$true] %s921_s21  ;;  %s1186_s14 = int_to_ptr.vmem [resolvable:$false] %s1185_s14 }
  0x20   : > { %1070 = vmatmul.mubr.msk.f32.vlgmr.msra.gmra.mrb[0].mxu0 %vm393_vm1, %v397_v5  ;;  %1075 = vmatmul.mubr.msk.f32.vlgmr.msra.gmra.mrb[0].mxu1 %vm393_vm1, %v384_v6  ;;  %v1041_v5 = vld [vmem:[%s1510_s8] ss:$0 sm:$0xff]  ;;  %s1181_s16 = scalar_lea.vmem %s1462_s21, 128  ;;  %s1187_s17 = scalar_lea.vmem %s1186_s14, 256 }
  0x21   : > { %395 = vadd.xlane.f32.xlu0 %v394_v8  ;;  %1078 = vmatpush3.msra.mxu0 %v1371_v4  ;;  %v903_v8 = vld [vmem:[%s375_s25] sm:$0xff]  ;;  %p1182_p11 = scmp.ne.s32.totalorder %s1462_s21, %s1181_s16  ;;  %p1188_p0 = scmp.lt.s32.totalorder %s1462_s21, %s1186_s14 }
  0x22   : > { %1079 = vmatprep.mubr.msk.f32.mxu0 %vm1246_vm0, %v1245_v0  ;;  %1090 = vmatprep.mubr.msk.f32.mxu1 %vm1246_vm0, %v1245_v0  ;;  %p1189_p1 = scmp.lt.s32.totalorder %s1187_s17, %s1181_s16 }
  0x23   : > { %1121 = vmatprep.subr.bf16.mxu0 %v1248_v40  ;;  %1117 = vmatpush3.bf16.msra.mxu1 %v1116_v41  ;;  %p1183_p12 = pnand %p1182_p11, %p1338_p5 }
  0x24   : > { %1118 = vmatprep.subr.bf16.mxu1 %v1248_v40  ;;  %p1190_p2 = por %p1189_p1, %p1188_p0 }
  0x25   : > { %p1184_p13 = pneg %p1183_p12 }
  0x27   : > { %1120 = vmatpush3.bf16.msra.mxu1 %v1119_v43  ;;  %p1191_p3 = pnand %p1190_p2, %p1184_p13 }
  0x28   : > { %1127 = vmatprep.subr.bf16.mxu1 %v1248_v40 }
  0x2a   : > { %1091 = vmatmul.mubr.msk.f32.vlgmr.msra.gmra.mrb[2].mxu1 %vm393_vm1, %v1371_v4 }
  0x2b   : > { %1129 = vmatpush3.bf16.msra.mxu1 %v1128_v46  ;;  %1112 = vmatprep.mubr.msk.f32.mxu1 %vm1246_vm0, %v1245_v0 }
  0x2c   : > { %1130 = vmatprep.subr.bf16.mxu1 %v1248_v40 }
  0x2f   : > { %1132 = vmatpush3.bf16.msra.mxu1 %v1131_v58 }
  0x37   : > { %563 = vperm.xlu0 %1176, %v559_v9  }
  0xae   : > { %v396_v11 = vpop.xlane.xlu0 %395 }
  0xb6   : > { %v564_v14 = vpop.permute.xlu0 %563 }
  0xb7   : > { %v572_v16 = vmul.f32 %v1028_v15, %v564_v14 }
  0xb9   : > { %v573_v18 = vmul.f32 %v1027_v17, %v572_v16 }
  0xbb   : > { %v575_v20 = vsub.f32 1.0, %v573_v18 }
  0xbd   : > { %v576_v28 = vmul.f32 -1e+30, %v575_v20 }
  0xf3   : > { %v470_v21 = vpop.f32.mrb[0].mxu0  ;;  %v543_v22 = vpop.f32.mrb[0].mxu1 }
  0xf4   : > { %v550_v23 = vrot.slane %v470_v21, %v549_v19  ;;  %v544_v24 = vadd.f32 %v543_v22, %v396_v11  ;;  %v1071_v25 = vpop.f32.mrb[1].mxu0  ;;  %v1076_v26 = vpop.f32.mrb[1].mxu1 }
  0xf6   : > { %v551_v27 = vadd.f32 %v550_v23, %v544_v24 }
  0xf8   : > { %v574_v29 = vmul.f32 %v573_v18, %v551_v27 }
  0xfa   : > { %v577_v30 = vadd.f32 %v576_v28, %v574_v29 }
  0xfc   : > { %v579_v31 = vsel %vm578_vm3, %v577_v30, -inf }
  0xfd   : > { %580 = vmax.xlane.f32.xlu1 %v579_v31  ;;  %v738_v59 = vpop.f32.mrb[2].mxu1 }
  0xfe   : > { %v1092_v60 = vpop.f32.mrb[3].mxu1 }
 0x18a   : > { %v581_v32 = vpop.xlane.xlu1 %580 }
 0x18b   : > { %v582_v33 = vsub.f32 %v577_v30, %v581_v32 }
 0x18d   : > { %v583_v34 = vmul.f32 1.442695, %v582_v33 }
 0x18f   : > { %1177 = vpow2.f32 %v583_v34 }
 0x199   : > { %v1178_v35 = vpop.eup %1177 }
 0x19a   : > { %v585_v36 = vsel %vm578_vm3, %v1178_v35, 0.0 }
 0x19b   : > { %586 = vadd.xlane.f32.xlu1 %v585_v36 }
 0x228   : > { %v587_v47 = vpop.xlane.xlu1 %586 }
 0x229   : > { %1179 = vrcp.f32 %v587_v47 }
 0x233   : > { %v1180_v50 = vpop.eup %1179 }
 0x234   : > { %v589_v52 = vmul.f32 %v1180_v50, %v1178_v35 }
 0x236   : > { %1080 = vmatmul.mubr.msk.f32.vlgmr.msra.gmra.mrb[2].mxu0 %vm578_vm3, %v589_v52 }
 0x237   : > { %1123 = vmatpush3.bf16.msra.mxu0 %v1122_v51  ;;  %1101 = vmatprep.mubr.msk.f32.mxu0 %vm1246_vm0, %v1245_v0 }
 0x238   : > { %1124 = vmatprep.subr.bf16.mxu0 %v1248_v40 }
 0x23b   : > { %1126 = vmatpush3.bf16.msra.mxu0 %v1125_v55 }
 0x309   : > { %v659_v61 = vpop.f32.mrb[2].mxu0 }
 0x30a   : > { %v815_v62 = vmul.f32 %v659_v61, %v1371_v4  ;;  %v1081_v63 = vpop.f32.mrb[3].mxu0  ;;  %1102 = vmatmul.mubr.msk.f32.vlgmr.msra.gmra.mrb[4].mxu0 %vm393_vm1, %v659_v61 }
 0x30c   : > { %1113 = vmatmul.mubr.msk.f32.vlgmr.msra.gmra.mrb[4].mxu1 %vm393_vm1, %v815_v62 }
 0x3dd   : > { %v811_v0 = vpop.f32.mrb[4].mxu0 }
 0x3de   : > { %v812_v1 = vadd.f32 %v811_v0, %v738_v59  ;;  %v1103_v2 = vpop.f32.mrb[5].mxu0 }
 0x3df   : > { %v890_v3 = vpop.f32.mrb[4].mxu1 }
 0x3e0   : > { %v894_v4 = vadd.f32 %v890_v3, %v812_v1  ;;  %v1114_v6 = vpop.f32.mrb[5].mxu1 }
 0x3e2   : > { %v902_v7 = vadd.f32 %v1041_v5, %v894_v4 }
 0x3e4   : > { %v904_v9 = vmax.f32 %v902_v7, 0.0 }
 0x3e6   : > { %v905_v10 = vadd.f32 %v904_v9, %v903_v8 }
 0x3e8   : > { %906 = vst [vmem:[%s360_s27] sm:$0xff] %v905_v10 }
 0x3e9   : > { %1194 = shalt.err (!%p1191_p3)
}
 0x3ea   : > { %s1195_s0 = scalar_lea.hbm %s1460_s1, 128  ;;  %s1199_s24 = scalar_lea.hbm %s1511_s9, 256 }
 0x3eb   : > { %p1196_p4 = scmp.ne.s32.totalorder %s1460_s1, %s1195_s0  ;;  %p1200_p9 = scmp.lt.u32.totalorder %s1460_s1, %s1511_s9 }
 0x3ec   : > { %p1201_p10 = scmp.lt.u32.totalorder %s1199_s24, %s1195_s0  ;;  %p1203_p12 = scmp.lt.u32.totalorder %s1195_s0, %s1460_s1 }
 0x3ed   : > { %p1197_p7 = pnand %p1196_p4, %p1338_p5 }
 0x3ee   : > { %p1202_p11 = por %p1201_p10, %p1200_p9 }
 0x3ef   : > { %p1198_p8 = pneg %p1197_p7 }
 0x3f0   : > { %p1204_p13 = por %p1203_p12, %p1202_p11 }
 0x3f2   : > { %p1205_p0 = pnand %p1204_p13, %p1198_p8 }
 0x3f4   : > { %1208 = shalt.err (!%p1205_p0)
}
 0x3f5   : > { %1133 = dma.vmem_to_hbm [thread:$0]  (%p1338_p5), %s1462_s21, 128, %s1460_s1, %s908_s22  }
 0x3f6 PF: > { %p1139_p1 = scmp.ge.s32.totalorder %s1243_s12, 2  ;;  %s933_s27 = sand.u32 1, %s1231_s30  }
 0x3f7   : > { %s934_s28 = scalar_lea.sflag [#allocation3], %s933_s27 }
 0x3f8   : > { %p1136_p2 = pnand %p1139_p1, %p1342_p6 }
 0x3fa   : > { %1226 = dma.done.wait (!%p1136_p2), %s934_s28, 128  }
 0x3fb   : > { %1228 = vsyncadd (!%p1136_p2), %s934_s28, 4294967168  ;;  %p19_p3 = scmp.ge.s32.totalorder %s1325_s15, 4   ;;  %s1518_s30 = smov %s1235_s10 }
 0x3fc   : > { %s1519_s10 = smov %s1239_s11  ;;  %s1520_s11 = smov %s1336_s18 }
 0x3fd   : > { %s1521_s12 = smov %s1325_s15  ;;  %21 = sbr.rel (!%p19_p3) target bundleno = 6 (0x6), region = 102 }
 0x404   :  { %939 = vsyncpa [#allocation3], 1 }
 0x405   :  { %941 = vsyncpa [#allocation3 + $0x1], 1 }

</bundles_post_ra>
